<compile_context>
chip_gen: v6e
topology: v6e:2x2x1
jax: 0.10.0
libtpu: 0.0.40
codegen_flags: <defaults>
</compile_context>

<pallas_src>
import math

import jax
import jax.numpy as jnp
from jax.experimental import pallas as pl
from jax.experimental.pallas import tpu as pltpu

# ---------------------------------------------------------------------------
# Problem sizes (small, consistent with the module's forward)
# ---------------------------------------------------------------------------
BATCH = 2
SEQ = 8
INPUT_DIM = 32
HIDDEN_DIM1 = 32
HIDDEN_DIM2 = 32
NUM_HEADS = 4
NUM_CLASSES = 8
LN_EPS = 1e-5

EMBED = INPUT_DIM                      # all three widths are 32 in this model
HEAD_DIM = EMBED // NUM_HEADS          # 8
N_TOK = BATCH * SEQ                    # 16 tokens, batch fused into sublanes
SCALE = 1.0 / math.sqrt(HEAD_DIM)

SEQ_SHIFT = SEQ.bit_length() - 1       # 3
HEAD_SHIFT = HEAD_DIM.bit_length() - 1 # 3
TOK_SHIFT = N_TOK.bit_length() - 1     # 4

assert INPUT_DIM == HIDDEN_DIM1 == HIDDEN_DIM2 == EMBED
assert SEQ & (SEQ - 1) == 0 and N_TOK & (N_TOK - 1) == 0
assert HEAD_DIM & (HEAD_DIM - 1) == 0 and EMBED % NUM_HEADS == 0

# ---------------------------------------------------------------------------
# Packed parameter slab layout (lanes = 128, all row offsets 16-aligned)
# ---------------------------------------------------------------------------
LANES = 128
R_WQKV, R_WO, R_WL, R_VEC = 0, 32, 64, 96           # per-block row offsets
V_BQKV, V_BO, V_G1, V_B1, V_BL, V_G2, V_B2 = range(7)
BLOCK_ROWS = 112                                     # rows per AttentionBlock chunk
HEAD_BASE = 2 * BLOCK_ROWS                           # 224
R_WF = HEAD_BASE                                     # classifier weight rows
R_BF = HEAD_BASE + EMBED                             # classifier bias row (256)
TOTAL_ROWS = 272                                     # padded, multiple of 16
OUT_ROWS = 8                                         # sublane-padded logits tile


def pack_params(params, dtype=jnp.bfloat16):
    """Pack all 22 parameter tensors into ONE lane-padded (272, 128) slab."""
    slab = jnp.zeros((TOTAL_ROWS, LANES), jnp.float32)

    def put(s, row, arr):
        r, c = arr.shape
        return s.at[row:row + r, 0:c].set(arr)

    for bi, blk in enumerate(("block1", "block2")):
        p = params[blk]
        base = bi * BLOCK_ROWS
        slab = put(slab, base + R_WQKV, p["wqkv"])
        slab = put(slab, base + R_WO, p["wo"])
        slab = put(slab, base + R_WL, p["wl"])
        for off, name in ((V_BQKV, "bqkv"), (V_BO, "bo"), (V_G1, "g1"),
                          (V_B1, "b1"), (V_BL, "bl"), (V_G2, "g2"), (V_B2, "b2")):
            slab = put(slab, base + R_VEC + off, p[name])
    slab = put(slab, R_WF, params["wf"])
    slab = put(slab, R_BF, params["bf"])
    return slab.astype(dtype)


# ---------------------------------------------------------------------------
# Kernel
# ---------------------------------------------------------------------------
def _layernorm(x, gamma, beta):
    """LayerNorm over the last axis (population variance, like PyTorch)."""
    mean = jnp.mean(x, axis=-1, keepdims=True)
    var = jnp.mean((x - mean) ** 2, axis=-1, keepdims=True)
    return (x - mean) * jax.lax.rsqrt(var + LN_EPS) * gamma + beta


def _load_block(w_ref, base):
    """Carve one AttentionBlock's parameters out of the packed slab."""
    f32 = jnp.float32
    e = EMBED
    wqkv = w_ref[base + R_WQKV:base + R_WQKV + e, 0:3 * e].astype(f32)   # (32, 96)
    wo = w_ref[base + R_WO:base + R_WO + e, 0:e].astype(f32)             # (32, 32)
    wl = w_ref[base + R_WL:base + R_WL + e, 0:e].astype(f32)             # (32, 32)
    vec = w_ref[base + R_VEC:base + R_VEC + 8, :].astype(f32)            # (8, 128)
    bqkv = vec[V_BQKV:V_BQKV + 1, 0:3 * e]
    bo = vec[V_BO:V_BO + 1, 0:e]
    g1 = vec[V_G1:V_G1 + 1, 0:e]
    b1 = vec[V_B1:V_B1 + 1, 0:e]
    bl = vec[V_BL:V_BL + 1, 0:e]
    g2 = vec[V_G2:V_G2 + 1, 0:e]
    b2 = vec[V_B2:V_B2 + 1, 0:e]
    return wqkv, bqkv, wo, bo, g1, b1, wl, bl, g2, b2


def _attention_block(x, p, head_mask, neg_mask):
    """One AttentionBlock on the batch-fused activation x of shape (N_TOK, E)."""
    wqkv, bqkv, wo, bo, g1, b1, wl, bl, g2, b2 = p
    e = EMBED

    # --- fused QKV projection: one (16,32) @ (32,96) dot ---------------------
    qkv = jnp.dot(x, wqkv, preferred_element_type=jnp.float32) + bqkv    # (16, 96)
    q = qkv[:, 0:e]
    k = qkv[:, e:2 * e]
    v = qkv[:, 2 * e:3 * e]

    # --- all-head, all-batch scores in ONE dot -------------------------------
    # Qhat stacks the H head-copies of q along sublanes, masked to each head's
    # lane block, so Qhat . K^T (contracting the last dims, no transpose)
    # yields the (H*N, N) per-head score blocks directly.
    q_hat = jnp.concatenate([q] * NUM_HEADS, axis=0) * head_mask         # (64, 32)
    scores = jax.lax.dot_general(q_hat, k, (((1,), (1,)), ((), ())),
                                 preferred_element_type=jnp.float32)     # (64, 16)
    scores = scores * SCALE + neg_mask                                   # batch mask

    # --- single softmax over all (head, batch) row blocks --------------------
    m = jnp.max(scores, axis=-1, keepdims=True)
    ex = jnp.exp(scores - m)
    denom = jnp.sum(ex, axis=-1, keepdims=True)
    p_attn = ex * pl.reciprocal(denom, approx=True)

    # --- PV in ONE dot, "concat heads" via head mask + 3 vreg adds -----------
    ov = jnp.dot(p_attn, v, preferred_element_type=jnp.float32) * head_mask  # (64, 32)
    heads = ov[0:N_TOK, :]
    for hi in range(1, NUM_HEADS):
        heads = heads + ov[hi * N_TOK:(hi + 1) * N_TOK, :]               # (16, 32)
    attn = jnp.dot(heads, wo, preferred_element_type=jnp.float32) + bo

    # dropout_attn: identity (eval mode)
    y = _layernorm(x + attn, g1, b1)

    # --- Linear + ReLU + (dropout identity) + LayerNorm 2 --------------------
    z = jnp.dot(y, wl, preferred_element_type=jnp.float32) + bl
    z = jnp.maximum(z, 0.0)
    return _layernorm(z, g2, b2)


def transformer_classifier_kernel(x_ref, w_ref, o_ref):
    f32 = jnp.float32
    x = x_ref[...]                                                       # (16, 32)

    # ---- constants built ONCE and shared by both attention blocks ----------
    hn = NUM_HEADS * N_TOK
    r_he = jax.lax.broadcasted_iota(jnp.int32, (hn, EMBED), 0)
    c_he = jax.lax.broadcasted_iota(jnp.int32, (hn, EMBED), 1)
    head_mask = ((r_he >> TOK_SHIFT) == (c_he >> HEAD_SHIFT)).astype(f32)

    r_s = jax.lax.broadcasted_iota(jnp.int32, (hn, N_TOK), 0)
    c_s = jax.lax.broadcasted_iota(jnp.int32, (hn, N_TOK), 1)
    neg_mask = jnp.where(
        ((r_s & (N_TOK - 1)) >> SEQ_SHIFT) == (c_s >> SEQ_SHIFT),
        0.0, -1e30).astype(f32)

    r_p = jax.lax.broadcasted_iota(jnp.int32, (OUT_ROWS, N_TOK), 0)
    c_p = jax.lax.broadcasted_iota(jnp.int32, (OUT_ROWS, N_TOK), 1)
    pool = ((c_p >> SEQ_SHIFT) == r_p).astype(f32) * (1.0 / SEQ)         # (8, 16)

    # ---- two fused AttentionBlocks ------------------------------------------
    h1 = _attention_block(x, _load_block(w_ref, 0), head_mask, neg_mask)
    h2 = _attention_block(h1, _load_block(w_ref, BLOCK_ROWS), head_mask, neg_mask)

    # ---- AdaptiveAvgPool1d(1) over the sequence as one dot, then the head ---
    pooled = jnp.dot(pool, h2, preferred_element_type=f32)               # (8, 32)
    wf = w_ref[R_WF:R_WF + EMBED, :].astype(f32)                         # (32, 128) zero-padded
    bf = w_ref[R_BF:R_BF + 1, :].astype(f32)                             # (1, 128) zero-padded
    o_ref[...] = jnp.dot(pooled, wf, preferred_element_type=f32) + bf    # full-tile store


def transformer_classifier(x, packed_params):
    """x: (B, S, E) float32.  packed_params: (272, 128) slab from pack_params."""
    b, s, e = x.shape
    assert (b, s, e) == (BATCH, SEQ, INPUT_DIM)
    x2d = x.reshape(b * s, e)                      # fuse batch into sublane axis

    out_pad = pl.pallas_call(
        transformer_classifier_kernel,
        out_shape=jax.ShapeDtypeStruct((OUT_ROWS, LANES), jnp.float32),
        in_specs=[pl.BlockSpec(memory_space=pltpu.MemorySpace.VMEM),
                  pl.BlockSpec(memory_space=pltpu.MemorySpace.VMEM)],
        out_specs=pl.BlockSpec(memory_space=pltpu.MemorySpace.VMEM),
    )(x2d, packed_params)
    return out_pad[:BATCH, :NUM_CLASSES]


# ---------------------------------------------------------------------------
# Pure-JAX reference (mirrors PyTorch semantics) for a correctness check
# ---------------------------------------------------------------------------
def _attention_block_ref(x, p):
    bsz, seq, e = x.shape
    dh = e // NUM_HEADS
    qkv = x @ p["wqkv"] + p["bqkv"][0]
    q, k, v = qkv[..., :e], qkv[..., e:2 * e], qkv[..., 2 * e:]

    def split(t):  # (B, S, E) -> (B, H, S, Dh)
        return t.reshape(bsz, seq, NUM_HEADS, dh).transpose(0, 2, 1, 3)

    qh, kh, vh = split(q), split(k), split(v)
    scores = jnp.einsum("bhqd,bhkd->bhqk", qh, kh) / math.sqrt(dh)
    pmat = jax.nn.softmax(scores, axis=-1)
    o = jnp.einsum("bhqk,bhkd->bhqd", pmat, vh)
    o = o.transpose(0, 2, 1, 3).reshape(bsz, seq, e)
    attn = o @ p["wo"] + p["bo"][0]

    def ln(t, g, bb):
        mu = jnp.mean(t, -1, keepdims=True)
        var = jnp.mean((t - mu) ** 2, -1, keepdims=True)
        return (t - mu) * jax.lax.rsqrt(var + LN_EPS) * g[0] + bb[0]

    y = ln(x + attn, p["g1"], p["b1"])
    z = jnp.maximum(y @ p["wl"] + p["bl"][0], 0.0)
    return ln(z, p["g2"], p["b2"])


def reference(x, params):
    h = _attention_block_ref(x, params["block1"])
    h = _attention_block_ref(h, params["block2"])
    pooled = jnp.mean(h, axis=1)                 # transpose + AdaptiveAvgPool1d(1)
    return pooled @ params["wf"] + params["bf"][0]


def _make_block_params(key, e_in, e_out):
    ks = jax.random.split(key, 6)
    sc = 0.1
    return {
        "wqkv": sc * jax.random.normal(ks[0], (e_in, 3 * e_in), jnp.float32),
        "bqkv": sc * jax.random.normal(ks[1], (1, 3 * e_in), jnp.float32),
        "wo":   sc * jax.random.normal(ks[2], (e_in, e_in), jnp.float32),
        "bo":   sc * jax.random.normal(ks[3], (1, e_in), jnp.float32),
        "g1":   jnp.ones((1, e_in), jnp.float32),
        "b1":   jnp.zeros((1, e_in), jnp.float32),
        "wl":   sc * jax.random.normal(ks[4], (e_in, e_out), jnp.float32),
        "bl":   sc * jax.random.normal(ks[5], (1, e_out), jnp.float32),
        "g2":   jnp.ones((1, e_out), jnp.float32),
        "b2":   jnp.zeros((1, e_out), jnp.float32),
    }


def make_params(key):
    k1, k2, k3, k4 = jax.random.split(key, 4)
    return {
        "block1": _make_block_params(k1, INPUT_DIM, HIDDEN_DIM1),
        "block2": _make_block_params(k2, HIDDEN_DIM1, HIDDEN_DIM2),
        "wf": 0.1 * jax.random.normal(k3, (HIDDEN_DIM2, NUM_CLASSES), jnp.float32),
        "bf": 0.1 * jax.random.normal(k4, (1, NUM_CLASSES), jnp.float32),
    }


def _round_like_device(tree):
    """bf16 round-trip so the f32 reference uses the same stored weight values."""
    return jax.tree_util.tree_map(
        lambda a: a.astype(jnp.bfloat16).astype(jnp.float32), tree)


if __name__ == "__main__":
    key = jax.random.PRNGKey(0)
    kx, kp = jax.random.split(key)
    x = jax.random.normal(kx, (BATCH, SEQ, INPUT_DIM), jnp.float32)
    params = make_params(kp)

    packed = pack_params(params, dtype=jnp.bfloat16)   # one bf16 weight slab
    out = transformer_classifier(x, packed)
    out = jax.block_until_ready(out)

    ref = reference(x, _round_like_device(params))     # same bf16-stored weights
    assert out.shape == (BATCH, NUM_CLASSES)
    assert jnp.allclose(out, ref, atol=5e-3, rtol=5e-3), "mismatch vs reference"

    print("KERNEL_OK")
</pallas_src>

<mosaic_0001>
module attributes {stable_mosaic.version = 11 : i64} {
  func.func @transformer_classifier_kernel(%arg0: memref<16x32xf32, #tpu.memory_space<vmem>>, %arg1: memref<272x128xbf16, #tpu.memory_space<vmem>>, %arg2: memref<8x128xf32, #tpu.memory_space<vmem>>) attributes {dimension_semantics = [], scalar_prefetch = 0 : i64, scratch_operands = 0 : i64, tpu.core_type = #tpu.core_type<tc>} {
    %c0 = arith.constant 0 : index
    %c0_0 = arith.constant 0 : index
    %0 = vector.load %arg0[%c0, %c0_0] : memref<16x32xf32, #tpu.memory_space<vmem>>, vector<16x32xf32>
    %1 = tpu.iota {dimensions = array<i32: 0>} : vector<64x32xi32>
    %2 = tpu.iota {dimensions = array<i32: 1>} : vector<64x32xi32>
    %c4_i32 = arith.constant 4 : i32
    %3 = vector.broadcast %c4_i32 : i32 to vector<64x32xi32>
    %4 = arith.shrsi %1, %3 : vector<64x32xi32>
    %c3_i32 = arith.constant 3 : i32
    %5 = vector.broadcast %c3_i32 : i32 to vector<64x32xi32>
    %6 = arith.shrsi %2, %5 : vector<64x32xi32>
    %7 = arith.cmpi eq, %4, %6 : vector<64x32xi32>
    %8 = arith.extui %7 : vector<64x32xi1> to vector<64x32xi32>
    %9 = arith.sitofp %8 : vector<64x32xi32> to vector<64x32xf32>
    %10 = tpu.iota {dimensions = array<i32: 0>} : vector<64x16xi32>
    %11 = tpu.iota {dimensions = array<i32: 1>} : vector<64x16xi32>
    %c15_i32 = arith.constant 15 : i32
    %12 = vector.broadcast %c15_i32 : i32 to vector<64x16xi32>
    %13 = arith.andi %10, %12 : vector<64x16xi32>
    %c3_i32_1 = arith.constant 3 : i32
    %14 = vector.broadcast %c3_i32_1 : i32 to vector<64x16xi32>
    %15 = arith.shrsi %13, %14 : vector<64x16xi32>
    %c3_i32_2 = arith.constant 3 : i32
    %16 = vector.broadcast %c3_i32_2 : i32 to vector<64x16xi32>
    %17 = arith.shrsi %11, %16 : vector<64x16xi32>
    %18 = arith.cmpi eq, %15, %17 : vector<64x16xi32>
    %cst = arith.constant 0.000000e+00 : f32
    %cst_3 = arith.constant -1.000000e+30 : f32
    %19 = vector.broadcast %cst : f32 to vector<64x16xf32>
    %20 = vector.broadcast %cst_3 : f32 to vector<64x16xf32>
    %21 = arith.select %18, %19, %20 : vector<64x16xi1>, vector<64x16xf32>
    %22 = tpu.iota {dimensions = array<i32: 0>} : vector<8x16xi32>
    %23 = tpu.iota {dimensions = array<i32: 1>} : vector<8x16xi32>
    %c3_i32_4 = arith.constant 3 : i32
    %24 = vector.broadcast %c3_i32_4 : i32 to vector<8x16xi32>
    %25 = arith.shrsi %23, %24 : vector<8x16xi32>
    %26 = arith.cmpi eq, %25, %22 : vector<8x16xi32>
    %27 = arith.extui %26 : vector<8x16xi1> to vector<8x16xi32>
    %28 = arith.sitofp %27 : vector<8x16xi32> to vector<8x16xf32>
    %cst_5 = arith.constant 1.250000e-01 : f32
    %29 = vector.broadcast %cst_5 : f32 to vector<8x16xf32>
    %30 = arith.mulf %28, %29 : vector<8x16xf32>
    %c0_6 = arith.constant 0 : index
    %c0_7 = arith.constant 0 : index
    %31 = vector.load %arg1[%c0_6, %c0_7] : memref<272x128xbf16, #tpu.memory_space<vmem>>, vector<32x96xbf16>
    %32 = arith.extf %31 : vector<32x96xbf16> to vector<32x96xf32>
    %c32 = arith.constant 32 : index
    %c0_8 = arith.constant 0 : index
    %33 = vector.load %arg1[%c32, %c0_8] : memref<272x128xbf16, #tpu.memory_space<vmem>>, vector<32x32xbf16>
    %34 = arith.extf %33 : vector<32x32xbf16> to vector<32x32xf32>
    %c64 = arith.constant 64 : index
    %c0_9 = arith.constant 0 : index
    %35 = vector.load %arg1[%c64, %c0_9] : memref<272x128xbf16, #tpu.memory_space<vmem>>, vector<32x32xbf16>
    %36 = arith.extf %35 : vector<32x32xbf16> to vector<32x32xf32>
    %c96 = arith.constant 96 : index
    %c0_10 = arith.constant 0 : index
    %37 = vector.load %arg1[%c96, %c0_10] : memref<272x128xbf16, #tpu.memory_space<vmem>>, vector<8x128xbf16>
    %38 = arith.extf %37 : vector<8x128xbf16> to vector<8x128xf32>
    %39 = vector.extract_strided_slice %38 {offsets = [0, 0], sizes = [1, 96], strides = [1, 1]} : vector<8x128xf32> to vector<1x96xf32>
    %40 = vector.extract_strided_slice %38 {offsets = [1, 0], sizes = [1, 32], strides = [1, 1]} : vector<8x128xf32> to vector<1x32xf32>
    %41 = vector.extract_strided_slice %38 {offsets = [2, 0], sizes = [1, 32], strides = [1, 1]} : vector<8x128xf32> to vector<1x32xf32>
    %42 = vector.extract_strided_slice %38 {offsets = [3, 0], sizes = [1, 32], strides = [1, 1]} : vector<8x128xf32> to vector<1x32xf32>
    %43 = vector.extract_strided_slice %38 {offsets = [4, 0], sizes = [1, 32], strides = [1, 1]} : vector<8x128xf32> to vector<1x32xf32>
    %44 = vector.extract_strided_slice %38 {offsets = [5, 0], sizes = [1, 32], strides = [1, 1]} : vector<8x128xf32> to vector<1x32xf32>
    %45 = vector.extract_strided_slice %38 {offsets = [6, 0], sizes = [1, 32], strides = [1, 1]} : vector<8x128xf32> to vector<1x32xf32>
    %cst_11 = arith.constant dense<0.000000e+00> : vector<16x96xf32>
    %46 = tpu.matmul %0, %32, %cst_11 {dimension_numbers = #tpu.dot_dimension_numbers<[1], [0], [0], [1], [0, 0, 1, 1], [], []>} : vector<16x32xf32>, vector<32x96xf32>, vector<16x96xf32> -> vector<16x96xf32>
    %47 = vector.broadcast %39 : vector<1x96xf32> to vector<16x96xf32>
    %48 = arith.addf %46, %47 : vector<16x96xf32>
    %49 = vector.extract_strided_slice %48 {offsets = [0, 0], sizes = [16, 32], strides = [1, 1]} : vector<16x96xf32> to vector<16x32xf32>
    %50 = vector.extract_strided_slice %48 {offsets = [0, 32], sizes = [16, 32], strides = [1, 1]} : vector<16x96xf32> to vector<16x32xf32>
    %51 = vector.extract_strided_slice %48 {offsets = [0, 64], sizes = [16, 32], strides = [1, 1]} : vector<16x96xf32> to vector<16x32xf32>
    %52 = tpu.concatenate %49, %49, %49, %49 in 0 : vector<16x32xf32>, vector<16x32xf32>, vector<16x32xf32>, vector<16x32xf32> -> vector<64x32xf32>
    %53 = arith.mulf %52, %9 : vector<64x32xf32>
    %cst_12 = arith.constant dense<0.000000e+00> : vector<64x16xf32>
    %54 = tpu.matmul %53, %50, %cst_12 {dimension_numbers = #tpu.dot_dimension_numbers<[1], [1], [0], [0], [0, 0, 1, 0], [], []>} : vector<64x32xf32>, vector<16x32xf32>, vector<64x16xf32> -> vector<64x16xf32>
    %cst_13 = arith.constant 0.353553385 : f32
    %55 = vector.broadcast %cst_13 : f32 to vector<64x16xf32>
    %56 = arith.mulf %54, %55 : vector<64x16xf32>
    %57 = arith.addf %56, %21 : vector<64x16xf32>
    %cst_14 = arith.constant dense<0xFF800000> : vector<64xf32>
    %58 = vector.multi_reduction <maximumf>, %57, %cst_14 [1] : vector<64x16xf32> to vector<64xf32>
    %59 = vector.shape_cast %58 : vector<64xf32> to vector<64x1xf32>
    %60 = vector.broadcast %59 : vector<64x1xf32> to vector<64x16xf32>
    %61 = arith.subf %57, %60 : vector<64x16xf32>
    %62 = math.exp %61 : vector<64x16xf32>
    %cst_15 = arith.constant dense<0.000000e+00> : vector<64xf32>
    %63 = vector.multi_reduction <add>, %62, %cst_15 [1] : vector<64x16xf32> to vector<64xf32>
    %64 = vector.shape_cast %63 : vector<64xf32> to vector<64x1xf32>
    %65 = tpu.reciprocal %64 {approx = true} : vector<64x1xf32> -> vector<64x1xf32>
    %66 = vector.broadcast %65 : vector<64x1xf32> to vector<64x16xf32>
    %67 = arith.mulf %62, %66 : vector<64x16xf32>
    %cst_16 = arith.constant dense<0.000000e+00> : vector<64x32xf32>
    %68 = tpu.matmul %67, %51, %cst_16 {dimension_numbers = #tpu.dot_dimension_numbers<[1], [0], [0], [1], [0, 0, 1, 1], [], []>} : vector<64x16xf32>, vector<16x32xf32>, vector<64x32xf32> -> vector<64x32xf32>
    %69 = arith.mulf %68, %9 : vector<64x32xf32>
    %70 = vector.extract_strided_slice %69 {offsets = [0, 0], sizes = [16, 32], strides = [1, 1]} : vector<64x32xf32> to vector<16x32xf32>
    %71 = vector.extract_strided_slice %69 {offsets = [16, 0], sizes = [16, 32], strides = [1, 1]} : vector<64x32xf32> to vector<16x32xf32>
    %72 = arith.addf %70, %71 : vector<16x32xf32>
    %73 = vector.extract_strided_slice %69 {offsets = [32, 0], sizes = [16, 32], strides = [1, 1]} : vector<64x32xf32> to vector<16x32xf32>
    %74 = arith.addf %72, %73 : vector<16x32xf32>
    %75 = vector.extract_strided_slice %69 {offsets = [48, 0], sizes = [16, 32], strides = [1, 1]} : vector<64x32xf32> to vector<16x32xf32>
    %76 = arith.addf %74, %75 : vector<16x32xf32>
    %cst_17 = arith.constant dense<0.000000e+00> : vector<16x32xf32>
    %77 = tpu.matmul %76, %34, %cst_17 {dimension_numbers = #tpu.dot_dimension_numbers<[1], [0], [0], [1], [0, 0, 1, 1], [], []>} : vector<16x32xf32>, vector<32x32xf32>, vector<16x32xf32> -> vector<16x32xf32>
    %78 = vector.broadcast %40 : vector<1x32xf32> to vector<16x32xf32>
    %79 = arith.addf %77, %78 : vector<16x32xf32>
    %80 = arith.addf %0, %79 : vector<16x32xf32>
    %cst_18 = arith.constant dense<0.000000e+00> : vector<16xf32>
    %81 = vector.multi_reduction <add>, %80, %cst_18 [1] : vector<16x32xf32> to vector<16xf32>
    %82 = vector.shape_cast %81 : vector<16xf32> to vector<16x1xf32>
    %cst_19 = arith.constant 3.200000e+01 : f32
    %83 = vector.broadcast %cst_19 : f32 to vector<16x1xf32>
    %84 = arith.divf %82, %83 : vector<16x1xf32>
    %85 = vector.broadcast %84 : vector<16x1xf32> to vector<16x32xf32>
    %86 = arith.subf %80, %85 : vector<16x32xf32>
    %87 = arith.mulf %86, %86 : vector<16x32xf32>
    %cst_20 = arith.constant dense<0.000000e+00> : vector<16xf32>
    %88 = vector.multi_reduction <add>, %87, %cst_20 [1] : vector<16x32xf32> to vector<16xf32>
    %89 = vector.shape_cast %88 : vector<16xf32> to vector<16x1xf32>
    %cst_21 = arith.constant 3.200000e+01 : f32
    %90 = vector.broadcast %cst_21 : f32 to vector<16x1xf32>
    %91 = arith.divf %89, %90 : vector<16x1xf32>
    %92 = vector.broadcast %84 : vector<16x1xf32> to vector<16x32xf32>
    %93 = arith.subf %80, %92 : vector<16x32xf32>
    %cst_22 = arith.constant 9.99999974E-6 : f32
    %94 = vector.broadcast %cst_22 : f32 to vector<16x1xf32>
    %95 = arith.addf %91, %94 : vector<16x1xf32>
    %96 = math.rsqrt %95 : vector<16x1xf32>
    %97 = vector.broadcast %96 : vector<16x1xf32> to vector<16x32xf32>
    %98 = arith.mulf %93, %97 : vector<16x32xf32>
    %99 = vector.broadcast %41 : vector<1x32xf32> to vector<16x32xf32>
    %100 = arith.mulf %98, %99 : vector<16x32xf32>
    %101 = vector.broadcast %42 : vector<1x32xf32> to vector<16x32xf32>
    %102 = arith.addf %100, %101 : vector<16x32xf32>
    %cst_23 = arith.constant dense<0.000000e+00> : vector<16x32xf32>
    %103 = tpu.matmul %102, %36, %cst_23 {dimension_numbers = #tpu.dot_dimension_numbers<[1], [0], [0], [1], [0, 0, 1, 1], [], []>} : vector<16x32xf32>, vector<32x32xf32>, vector<16x32xf32> -> vector<16x32xf32>
    %104 = vector.broadcast %43 : vector<1x32xf32> to vector<16x32xf32>
    %105 = arith.addf %103, %104 : vector<16x32xf32>
    %cst_24 = arith.constant 0.000000e+00 : f32
    %106 = vector.broadcast %cst_24 : f32 to vector<16x32xf32>
    %107 = arith.maximumf %105, %106 : vector<16x32xf32>
    %cst_25 = arith.constant dense<0.000000e+00> : vector<16xf32>
    %108 = vector.multi_reduction <add>, %107, %cst_25 [1] : vector<16x32xf32> to vector<16xf32>
    %109 = vector.shape_cast %108 : vector<16xf32> to vector<16x1xf32>
    %cst_26 = arith.constant 3.200000e+01 : f32
    %110 = vector.broadcast %cst_26 : f32 to vector<16x1xf32>
    %111 = arith.divf %109, %110 : vector<16x1xf32>
    %112 = vector.broadcast %111 : vector<16x1xf32> to vector<16x32xf32>
    %113 = arith.subf %107, %112 : vector<16x32xf32>
    %114 = arith.mulf %113, %113 : vector<16x32xf32>
    %cst_27 = arith.constant dense<0.000000e+00> : vector<16xf32>
    %115 = vector.multi_reduction <add>, %114, %cst_27 [1] : vector<16x32xf32> to vector<16xf32>
    %116 = vector.shape_cast %115 : vector<16xf32> to vector<16x1xf32>
    %cst_28 = arith.constant 3.200000e+01 : f32
    %117 = vector.broadcast %cst_28 : f32 to vector<16x1xf32>
    %118 = arith.divf %116, %117 : vector<16x1xf32>
    %119 = vector.broadcast %111 : vector<16x1xf32> to vector<16x32xf32>
    %120 = arith.subf %107, %119 : vector<16x32xf32>
    %cst_29 = arith.constant 9.99999974E-6 : f32
    %121 = vector.broadcast %cst_29 : f32 to vector<16x1xf32>
    %122 = arith.addf %118, %121 : vector<16x1xf32>
    %123 = math.rsqrt %122 : vector<16x1xf32>
    %124 = vector.broadcast %123 : vector<16x1xf32> to vector<16x32xf32>
    %125 = arith.mulf %120, %124 : vector<16x32xf32>
    %126 = vector.broadcast %44 : vector<1x32xf32> to vector<16x32xf32>
    %127 = arith.mulf %125, %126 : vector<16x32xf32>
    %128 = vector.broadcast %45 : vector<1x32xf32> to vector<16x32xf32>
    %129 = arith.addf %127, %128 : vector<16x32xf32>
    %c112 = arith.constant 112 : index
    %c0_30 = arith.constant 0 : index
    %130 = vector.load %arg1[%c112, %c0_30] : memref<272x128xbf16, #tpu.memory_space<vmem>>, vector<32x96xbf16>
    %131 = arith.extf %130 : vector<32x96xbf16> to vector<32x96xf32>
    %c144 = arith.constant 144 : index
    %c0_31 = arith.constant 0 : index
    %132 = vector.load %arg1[%c144, %c0_31] : memref<272x128xbf16, #tpu.memory_space<vmem>>, vector<32x32xbf16>
    %133 = arith.extf %132 : vector<32x32xbf16> to vector<32x32xf32>
    %c176 = arith.constant 176 : index
    %c0_32 = arith.constant 0 : index
    %134 = vector.load %arg1[%c176, %c0_32] : memref<272x128xbf16, #tpu.memory_space<vmem>>, vector<32x32xbf16>
    %135 = arith.extf %134 : vector<32x32xbf16> to vector<32x32xf32>
    %c208 = arith.constant 208 : index
    %c0_33 = arith.constant 0 : index
    %136 = vector.load %arg1[%c208, %c0_33] : memref<272x128xbf16, #tpu.memory_space<vmem>>, vector<8x128xbf16>
    %137 = arith.extf %136 : vector<8x128xbf16> to vector<8x128xf32>
    %138 = vector.extract_strided_slice %137 {offsets = [0, 0], sizes = [1, 96], strides = [1, 1]} : vector<8x128xf32> to vector<1x96xf32>
    %139 = vector.extract_strided_slice %137 {offsets = [1, 0], sizes = [1, 32], strides = [1, 1]} : vector<8x128xf32> to vector<1x32xf32>
    %140 = vector.extract_strided_slice %137 {offsets = [2, 0], sizes = [1, 32], strides = [1, 1]} : vector<8x128xf32> to vector<1x32xf32>
    %141 = vector.extract_strided_slice %137 {offsets = [3, 0], sizes = [1, 32], strides = [1, 1]} : vector<8x128xf32> to vector<1x32xf32>
    %142 = vector.extract_strided_slice %137 {offsets = [4, 0], sizes = [1, 32], strides = [1, 1]} : vector<8x128xf32> to vector<1x32xf32>
    %143 = vector.extract_strided_slice %137 {offsets = [5, 0], sizes = [1, 32], strides = [1, 1]} : vector<8x128xf32> to vector<1x32xf32>
    %144 = vector.extract_strided_slice %137 {offsets = [6, 0], sizes = [1, 32], strides = [1, 1]} : vector<8x128xf32> to vector<1x32xf32>
    %cst_34 = arith.constant dense<0.000000e+00> : vector<16x96xf32>
    %145 = tpu.matmul %129, %131, %cst_34 {dimension_numbers = #tpu.dot_dimension_numbers<[1], [0], [0], [1], [0, 0, 1, 1], [], []>} : vector<16x32xf32>, vector<32x96xf32>, vector<16x96xf32> -> vector<16x96xf32>
    %146 = vector.broadcast %138 : vector<1x96xf32> to vector<16x96xf32>
    %147 = arith.addf %145, %146 : vector<16x96xf32>
    %148 = vector.extract_strided_slice %147 {offsets = [0, 0], sizes = [16, 32], strides = [1, 1]} : vector<16x96xf32> to vector<16x32xf32>
    %149 = vector.extract_strided_slice %147 {offsets = [0, 32], sizes = [16, 32], strides = [1, 1]} : vector<16x96xf32> to vector<16x32xf32>
    %150 = vector.extract_strided_slice %147 {offsets = [0, 64], sizes = [16, 32], strides = [1, 1]} : vector<16x96xf32> to vector<16x32xf32>
    %151 = tpu.concatenate %148, %148, %148, %148 in 0 : vector<16x32xf32>, vector<16x32xf32>, vector<16x32xf32>, vector<16x32xf32> -> vector<64x32xf32>
    %152 = arith.mulf %151, %9 : vector<64x32xf32>
    %cst_35 = arith.constant dense<0.000000e+00> : vector<64x16xf32>
    %153 = tpu.matmul %152, %149, %cst_35 {dimension_numbers = #tpu.dot_dimension_numbers<[1], [1], [0], [0], [0, 0, 1, 0], [], []>} : vector<64x32xf32>, vector<16x32xf32>, vector<64x16xf32> -> vector<64x16xf32>
    %cst_36 = arith.constant 0.353553385 : f32
    %154 = vector.broadcast %cst_36 : f32 to vector<64x16xf32>
    %155 = arith.mulf %153, %154 : vector<64x16xf32>
    %156 = arith.addf %155, %21 : vector<64x16xf32>
    %cst_37 = arith.constant dense<0xFF800000> : vector<64xf32>
    %157 = vector.multi_reduction <maximumf>, %156, %cst_37 [1] : vector<64x16xf32> to vector<64xf32>
    %158 = vector.shape_cast %157 : vector<64xf32> to vector<64x1xf32>
    %159 = vector.broadcast %158 : vector<64x1xf32> to vector<64x16xf32>
    %160 = arith.subf %156, %159 : vector<64x16xf32>
    %161 = math.exp %160 : vector<64x16xf32>
    %cst_38 = arith.constant dense<0.000000e+00> : vector<64xf32>
    %162 = vector.multi_reduction <add>, %161, %cst_38 [1] : vector<64x16xf32> to vector<64xf32>
    %163 = vector.shape_cast %162 : vector<64xf32> to vector<64x1xf32>
    %164 = tpu.reciprocal %163 {approx = true} : vector<64x1xf32> -> vector<64x1xf32>
    %165 = vector.broadcast %164 : vector<64x1xf32> to vector<64x16xf32>
    %166 = arith.mulf %161, %165 : vector<64x16xf32>
    %cst_39 = arith.constant dense<0.000000e+00> : vector<64x32xf32>
    %167 = tpu.matmul %166, %150, %cst_39 {dimension_numbers = #tpu.dot_dimension_numbers<[1], [0], [0], [1], [0, 0, 1, 1], [], []>} : vector<64x16xf32>, vector<16x32xf32>, vector<64x32xf32> -> vector<64x32xf32>
    %168 = arith.mulf %167, %9 : vector<64x32xf32>
    %169 = vector.extract_strided_slice %168 {offsets = [0, 0], sizes = [16, 32], strides = [1, 1]} : vector<64x32xf32> to vector<16x32xf32>
    %170 = vector.extract_strided_slice %168 {offsets = [16, 0], sizes = [16, 32], strides = [1, 1]} : vector<64x32xf32> to vector<16x32xf32>
    %171 = arith.addf %169, %170 : vector<16x32xf32>
    %172 = vector.extract_strided_slice %168 {offsets = [32, 0], sizes = [16, 32], strides = [1, 1]} : vector<64x32xf32> to vector<16x32xf32>
    %173 = arith.addf %171, %172 : vector<16x32xf32>
    %174 = vector.extract_strided_slice %168 {offsets = [48, 0], sizes = [16, 32], strides = [1, 1]} : vector<64x32xf32> to vector<16x32xf32>
    %175 = arith.addf %173, %174 : vector<16x32xf32>
    %cst_40 = arith.constant dense<0.000000e+00> : vector<16x32xf32>
    %176 = tpu.matmul %175, %133, %cst_40 {dimension_numbers = #tpu.dot_dimension_numbers<[1], [0], [0], [1], [0, 0, 1, 1], [], []>} : vector<16x32xf32>, vector<32x32xf32>, vector<16x32xf32> -> vector<16x32xf32>
    %177 = vector.broadcast %139 : vector<1x32xf32> to vector<16x32xf32>
    %178 = arith.addf %176, %177 : vector<16x32xf32>
    %179 = arith.addf %129, %178 : vector<16x32xf32>
    %cst_41 = arith.constant dense<0.000000e+00> : vector<16xf32>
    %180 = vector.multi_reduction <add>, %179, %cst_41 [1] : vector<16x32xf32> to vector<16xf32>
    %181 = vector.shape_cast %180 : vector<16xf32> to vector<16x1xf32>
    %cst_42 = arith.constant 3.200000e+01 : f32
    %182 = vector.broadcast %cst_42 : f32 to vector<16x1xf32>
    %183 = arith.divf %181, %182 : vector<16x1xf32>
    %184 = vector.broadcast %183 : vector<16x1xf32> to vector<16x32xf32>
    %185 = arith.subf %179, %184 : vector<16x32xf32>
    %186 = arith.mulf %185, %185 : vector<16x32xf32>
    %cst_43 = arith.constant dense<0.000000e+00> : vector<16xf32>
    %187 = vector.multi_reduction <add>, %186, %cst_43 [1] : vector<16x32xf32> to vector<16xf32>
    %188 = vector.shape_cast %187 : vector<16xf32> to vector<16x1xf32>
    %cst_44 = arith.constant 3.200000e+01 : f32
    %189 = vector.broadcast %cst_44 : f32 to vector<16x1xf32>
    %190 = arith.divf %188, %189 : vector<16x1xf32>
    %191 = vector.broadcast %183 : vector<16x1xf32> to vector<16x32xf32>
    %192 = arith.subf %179, %191 : vector<16x32xf32>
    %cst_45 = arith.constant 9.99999974E-6 : f32
    %193 = vector.broadcast %cst_45 : f32 to vector<16x1xf32>
    %194 = arith.addf %190, %193 : vector<16x1xf32>
    %195 = math.rsqrt %194 : vector<16x1xf32>
    %196 = vector.broadcast %195 : vector<16x1xf32> to vector<16x32xf32>
    %197 = arith.mulf %192, %196 : vector<16x32xf32>
    %198 = vector.broadcast %140 : vector<1x32xf32> to vector<16x32xf32>
    %199 = arith.mulf %197, %198 : vector<16x32xf32>
    %200 = vector.broadcast %141 : vector<1x32xf32> to vector<16x32xf32>
    %201 = arith.addf %199, %200 : vector<16x32xf32>
    %cst_46 = arith.constant dense<0.000000e+00> : vector<16x32xf32>
    %202 = tpu.matmul %201, %135, %cst_46 {dimension_numbers = #tpu.dot_dimension_numbers<[1], [0], [0], [1], [0, 0, 1, 1], [], []>} : vector<16x32xf32>, vector<32x32xf32>, vector<16x32xf32> -> vector<16x32xf32>
    %203 = vector.broadcast %142 : vector<1x32xf32> to vector<16x32xf32>
    %204 = arith.addf %202, %203 : vector<16x32xf32>
    %cst_47 = arith.constant 0.000000e+00 : f32
    %205 = vector.broadcast %cst_47 : f32 to vector<16x32xf32>
    %206 = arith.maximumf %204, %205 : vector<16x32xf32>
    %cst_48 = arith.constant dense<0.000000e+00> : vector<16xf32>
    %207 = vector.multi_reduction <add>, %206, %cst_48 [1] : vector<16x32xf32> to vector<16xf32>
    %208 = vector.shape_cast %207 : vector<16xf32> to vector<16x1xf32>
    %cst_49 = arith.constant 3.200000e+01 : f32
    %209 = vector.broadcast %cst_49 : f32 to vector<16x1xf32>
    %210 = arith.divf %208, %209 : vector<16x1xf32>
    %211 = vector.broadcast %210 : vector<16x1xf32> to vector<16x32xf32>
    %212 = arith.subf %206, %211 : vector<16x32xf32>
    %213 = arith.mulf %212, %212 : vector<16x32xf32>
    %cst_50 = arith.constant dense<0.000000e+00> : vector<16xf32>
    %214 = vector.multi_reduction <add>, %213, %cst_50 [1] : vector<16x32xf32> to vector<16xf32>
    %215 = vector.shape_cast %214 : vector<16xf32> to vector<16x1xf32>
    %cst_51 = arith.constant 3.200000e+01 : f32
    %216 = vector.broadcast %cst_51 : f32 to vector<16x1xf32>
    %217 = arith.divf %215, %216 : vector<16x1xf32>
    %218 = vector.broadcast %210 : vector<16x1xf32> to vector<16x32xf32>
    %219 = arith.subf %206, %218 : vector<16x32xf32>
    %cst_52 = arith.constant 9.99999974E-6 : f32
    %220 = vector.broadcast %cst_52 : f32 to vector<16x1xf32>
    %221 = arith.addf %217, %220 : vector<16x1xf32>
    %222 = math.rsqrt %221 : vector<16x1xf32>
    %223 = vector.broadcast %222 : vector<16x1xf32> to vector<16x32xf32>
    %224 = arith.mulf %219, %223 : vector<16x32xf32>
    %225 = vector.broadcast %143 : vector<1x32xf32> to vector<16x32xf32>
    %226 = arith.mulf %224, %225 : vector<16x32xf32>
    %227 = vector.broadcast %144 : vector<1x32xf32> to vector<16x32xf32>
    %228 = arith.addf %226, %227 : vector<16x32xf32>
    %cst_53 = arith.constant dense<0.000000e+00> : vector<8x32xf32>
    %229 = tpu.matmul %30, %228, %cst_53 {dimension_numbers = #tpu.dot_dimension_numbers<[1], [0], [0], [1], [0, 0, 1, 1], [], []>} : vector<8x16xf32>, vector<16x32xf32>, vector<8x32xf32> -> vector<8x32xf32>
    %c224 = arith.constant 224 : index
    %c0_54 = arith.constant 0 : index
    %230 = vector.load %arg1[%c224, %c0_54] : memref<272x128xbf16, #tpu.memory_space<vmem>>, vector<32x128xbf16>
    %231 = arith.extf %230 : vector<32x128xbf16> to vector<32x128xf32>
    %c256 = arith.constant 256 : index
    %c0_55 = arith.constant 0 : index
    %232 = vector.load %arg1[%c256, %c0_55] : memref<272x128xbf16, #tpu.memory_space<vmem>>, vector<1x128xbf16>
    %233 = arith.extf %232 : vector<1x128xbf16> to vector<1x128xf32>
    %cst_56 = arith.constant dense<0.000000e+00> : vector<8x128xf32>
    %234 = tpu.matmul %229, %231, %cst_56 {dimension_numbers = #tpu.dot_dimension_numbers<[1], [0], [0], [1], [0, 0, 1, 1], [], []>} : vector<8x32xf32>, vector<32x128xf32>, vector<8x128xf32> -> vector<8x128xf32>
    %235 = vector.broadcast %233 : vector<1x128xf32> to vector<8x128xf32>
    %236 = arith.addf %234, %235 : vector<8x128xf32>
    %c0_57 = arith.constant 0 : index
    %c0_58 = arith.constant 0 : index
    %237 = vector.load %arg2[%c0_57, %c0_58] : memref<8x128xf32, #tpu.memory_space<vmem>>, vector<8x128xf32>
    tpu.vector_store %arg2[%c0_57, %c0_58], %236 {strides = array<i32>} : memref<8x128xf32, #tpu.memory_space<vmem>>, vector<8x128xf32>,
    return
  }
}

</mosaic_0001>

<bundles_post_ra>
// kernel: tpu_custom_call.1
= control target key start
LH: loop header
LB: loop body
LE: loop exit
PB: predicated region body
PF: predicated region fallthrough
CT: control target
= control target key end

     0   :  { %7 = vsyncpa [#allocation3], 0  ;;  %s2730_s0 = inlined_call_operand.hbm [shape: f32[16,32], index: 0, kind: input, shape index: {}]   ;;  %s2731_s1 = inlined_call_operand.hbm [shape: bf16[272,128], index: 1, kind: input, shape index: {}]   ;;  %s2732_s2 = inlined_call_operand.hbm [shape: f32[8,128], index: 2, kind: output, shape index: {}]  }
   0x1   :  { %8 = vsyncpa [#allocation6], 0 }
   0x2   :  { %9 = vsyncpa [#allocation4], 0  ;;  %s2341_s9 = smov [#allocation2]  }
   0x3   :  { %s15_s10 = sshll.u32 %s2341_s9, 4  ;;  %s16_s10 = int_to_ptr.vmem [resolvable:$true] %s15_s10 }
   0x4   :  { %s2283_s11 = scalar_lea.vmem %s16_s10, 256  ;;  %p2288_p1 = scmp.lt.s32.totalorder %s16_s10, %s16_s10 }
   0x5   :  { %p2284_p0 = scmp.ne.s32.totalorder %s16_s10, %s2283_s11  ;;  %p2289_p2 = scmp.lt.s32.totalorder %s2283_s11, %s2283_s11 }
   0x7   :  { %p2290_p3 = por %p2289_p2, %p2288_p1 }
   0x9   :  { %p2291_p4 = pnand %p2290_p3, %p2284_p0 }
   0xb   :  { %2294 = shalt.err (!%p2291_p4)
}
   0xc   :  { %s2342_s12 = smov 128   ;;  %s2343_s13 = smov 8  }
   0xd   :  { %21 = dma.hbm_to_vmem [thread:$0]  %s2730_s0, 256, %s16_s10, [#allocation3], %s2342_s12, %s2342_s12, %s2343_s13  }
   0xe   :  { %s2344_s16 = smov [#allocation5]  }
   0xf   :  { %s27_s17 = sshll.u32 %s2344_s16, 4  ;;  %s28_s17 = int_to_ptr.vmem [resolvable:$true] %s27_s17 }
  0x10   :  { %s2303_s18 = scalar_lea.vmem %s28_s17, 2176  ;;  %p2308_p6 = scmp.lt.s32.totalorder %s28_s17, %s28_s17 }
  0x11   :  { %p2304_p5 = scmp.ne.s32.totalorder %s28_s17, %s2303_s18  ;;  %p2309_p7 = scmp.lt.s32.totalorder %s2303_s18, %s2303_s18 }
  0x13   :  { %p2310_p8 = por %p2309_p7, %p2308_p6 }
  0x15   :  { %p2311_p9 = pnand %p2310_p8, %p2304_p5 }
  0x17   :  { %2314 = shalt.err (!%p2311_p9)
}
  0x18   :  { %s2345_s19 = smov 64   ;;  %s2346_s20 = smov 4  }
  0x19   :  { %33 = dma.hbm_to_vmem [thread:$0]  %s2731_s1, 2176, %s28_s17, [#allocation6], %s2345_s19, %s2345_s19, %s2346_s20  }
  0x1a   :  { %2335 = dma.done.wait [#allocation3], 256  }
  0x1b   :  { %2336 = vsyncadd [#allocation3], 4294967040 }
  0x1c   :  { %2337 = dma.done.wait [#allocation6], 2176  }
  0x1d   :  { %2338 = vsyncadd [#allocation6], 4294965120  ;;  %vm152_vm0 = vcmask 261120   ;;  %v1939_v0 = vld [vmem:[#allocation5 + $0x8] sm:$0xff]   ;;  %v1884_v1 = vld [vmem:[#allocation5] sm:$0xff]   ;;  %v42_v8 = vlaneseq  ;;  %v2347_v20 = vmov 0.0  }
  0x1e   :  { %v2375_v2 = vld [vmem:[#allocation2] sm:$0xff]  ;;  %v1889_v3 = vunpack.c.l.bf16 %v1939_v0  ;;  %v1890_v4 = vunpack.c.h.bf16 %v1939_v0  ;;  %v1886_v5 = vunpack.c.h.bf16 %v1884_v1  ;;  %v1885_v6 = vunpack.c.l.bf16 %v1884_v1  ;;  %v2379_v7 = vld [vmem:[#allocation2 + $0x8] sm:$0xff]  ;;  %s2348_s0 = smov 96   ;;  %s2351_s1 = smov [#allocation7]  }
  0x1f   :  { %2044 = vmatprep.mubr.msk.f32.mxu0 %vm152_vm0, %v2375_v2  ;;  %v2383_v9 = vshrl.u32 %v42_v8, 7  ;;  %v146_v10 = vld [vmem:[#allocation5 + $0x30] sm:$0xf]  ;;  %v52_v13 = vand.u32 127, %v42_v8  ;;  %v2349_v0 = vmov -1e+30  }
  0x20   :  { %2036 = vmatprep.subr.mxu0 %v1890_v4  ;;  %v2385_v11 = vunpack.c.l.bf16 %v146_v10  ;;  %vm397_vm11 = vcmask 130048   ;;  %s1814_s23 = sshll.u32 %s2351_s1, 4  ;;  %s1815_s23 = int_to_ptr.vmem [resolvable:$true] %s1814_s23 }
  0x21   :  { %2037 = vmatpush3.msra.mxu0 %v1890_v4  ;;  %v2388_v12 = vsub.s32 0, %v2383_v9  ;;  %v53_v14 = vshra.s32 %v2383_v9, 4  ;;  %v2393_v16 = vshra.s32 %v52_v13, 3  ;;  %v44_v24 = vadd.s32 8, %v2383_v9  ;;  %s2315_s24 = scalar_lea.vmem %s1815_s23, 128  ;;  %p2320_p11 = scmp.lt.s32.totalorder %s1815_s23, %s1815_s23 }
  0x22   :  { %2038 = vmatprep.subr.mxu0 %v1889_v3  ;;  %v45_v25 = vadd.s32 16, %v2383_v9  ;;  %v46_v27 = vadd.s32 24, %v2383_v9  ;;  %v2414_v29 = vadd.s32 32, %v2383_v9  ;;  %v48_v32 = vadd.s32 40, %v2383_v9  ;;  %p2316_p10 = scmp.ne.s32.totalorder %s1815_s23, %s2315_s24  ;;  %p2321_p12 = scmp.lt.s32.totalorder %s2315_s24, %s2315_s24 }
  0x23   :  { %2039 = vmatpush3.msra.mxu0 %v1889_v3  ;;  %v151_v15 = vrot.slane %v2385_v11, %v2388_v12  ;;  %vm62_vm1 = vcmp.eq.s32.totalorder %v53_v14, %v2393_v16  ;;  %v54_v26 = vshra.s32 %v44_v24, 4  ;;  %v2423_v34 = vadd.s32 48, %v2383_v9 }
  0x24   :  { %2040 = vmatprep.subr.mxu0 %v1886_v5  ;;  %v2399_v21 = vsel %vm62_vm1, 1.0, %v2347_v20  ;;  %v55_v28 = vshra.s32 %v45_v25, 4  ;;  %v56_v31 = vshra.s32 %v46_v27, 4  ;;  %v57_v33 = vshra.s32 %v2414_v29, 4  ;;  %p2322_p13 = por %p2321_p12, %p2320_p11 }
  0x25   :  { %2041 = vmatpush3.msra.mxu0 %v1886_v5  ;;  %vm63_vm2 = vcmp.eq.s32.totalorder %v54_v26, %v2393_v16  ;;  %v58_v38 = vshra.s32 %v48_v32, 4  ;;  %v2434_v39 = vadd.s32 56, %v2383_v9  ;;  %v59_v40 = vshra.s32 %v2423_v34, 4 }
  0x26   :  { %2042 = vmatprep.subr.mxu0 %v1885_v6  ;;  %vm64_vm3 = vcmp.eq.s32.totalorder %v55_v28, %v2393_v16  ;;  %v2426_v36 = vsel %vm63_vm2, 1.0, %v2347_v20  ;;  %vm65_vm4 = vcmp.eq.s32.totalorder %v56_v31, %v2393_v16  ;;  %vm66_vm5 = vcmp.eq.s32.totalorder %v57_v33, %v2393_v16  ;;  %p2323_p0 = pnand %p2322_p13, %p2316_p10 }
  0x27   :  { %2043 = vmatpush3.msra.mxu0 %v1885_v6  ;;  %v2430_v37 = vsel %vm64_vm3, 1.0, %v2347_v20  ;;  %v2444_v43 = vsel %vm65_vm4, 1.0, %v2347_v20  ;;  %v2448_v44 = vsel %vm66_vm5, 1.0, %v2347_v20  ;;  %vm67_vm6 = vcmp.eq.s32.totalorder %v58_v38, %v2393_v16 }
  0x28   :  { %2045 = vmatmul.mubr.msk.f32.vlgmr.msra.gmra.mxu0 %vm152_vm0, %v2379_v7  ;;  %v60_v45 = vshra.s32 %v2434_v39, 4  ;;  %vm68_vm7 = vcmp.eq.s32.totalorder %v59_v40, %v2393_v16  ;;  %v2459_v48 = vsel %vm67_vm6, 1.0, %v2347_v20  ;;  %v87_v54 = vand.u32 15, %v44_v24 }
  0x29   :  { %v2463_v49 = vsel %vm68_vm7, 1.0, %v2347_v20  ;;  %v86_v55 = vand.u32 15, %v2383_v9  ;;  %v88_v57 = vand.u32 15, %v45_v25  ;;  %v89_v58 = vand.u32 15, %v46_v27 }
  0x2a   :  { %vm69_vm8 = vcmp.eq.s32.totalorder %v60_v45, %v2393_v16  ;;  %v95_v56 = vshra.s32 %v87_v54, 3  ;;  %v91_v62 = vand.u32 15, %v48_v32  ;;  %v90_v13 = vand.u32 15, %v2414_v29 }
  0x2b   :  { %v2472_v52 = vsel %vm69_vm8, 1.0, %v2347_v20  ;;  %v94_v59 = vshra.s32 %v86_v55, 3  ;;  %v96_v60 = vshra.s32 %v88_v57, 3  ;;  %v97_v61 = vshra.s32 %v89_v58, 3 }
  0x2c   :  { %vm103_vm9 = vcmp.eq.s32.totalorder %v95_v56, %v2393_v16  ;;  %v99_v10 = vshra.s32 %v91_v62, 3  ;;  %v98_v27 = vshra.s32 %v90_v13, 3  ;;  %v92_v28 = vand.u32 15, %v2423_v34 }
  0x2d   :  { %vm102_vm10 = vcmp.eq.s32.totalorder %v94_v59, %v2393_v16  ;;  %v2482_v1 = vsel %vm103_vm9, 0.0, %v2349_v0  ;;  %vm104_vm12 = vcmp.eq.s32.totalorder %v96_v60, %v2393_v16  ;;  %vm105_vm13 = vcmp.eq.s32.totalorder %v97_v61, %v2393_v16 }
  0x2e   :  { %v2484_v5 = vsel %vm102_vm10, 0.0, %v2349_v0  ;;  %v2492_v24 = vsel %vm104_vm12, 0.0, %v2349_v0  ;;  %v2494_v25 = vsel %vm105_vm13, 0.0, %v2349_v0  ;;  %vm107_vm14 = vcmp.eq.s32.totalorder %v99_v10, %v2393_v16 }
  0x2f   :  { %v2501_v38 = vsel %vm107_vm14, 0.0, %v2349_v0  ;;  %vm106_vm15 = vcmp.eq.s32.totalorder %v98_v27, %v2393_v16  ;;  %vm2350_vm3 = vmmov 0   ;;  %vm118_vm4 = vcmp.eq.s32.totalorder %v2393_v16, %v2383_v9 }
  0xe8   :  { %v2046_v17 = vpop.f32.mrf.mxu0 }
  0xe9   :  { %v2396_v18 = vadd.f32 %v2046_v17, %v151_v15 }
  0xea   :  { %v225_v19 = vpop.f32.mrf.mxu0 }
  0xeb   :  { %v2401_v22 = vadd.f32 %v225_v19, %v151_v15  ;;  %246 = vrot.lane.b32.xlu0 %v2396_v18, %s2348_s0  ;;  %v235_v41 = vmul.f32 %v2426_v36, %v2396_v18  ;;  %v237_v46 = vmul.f32 %v2444_v43, %v2396_v18  ;;  %v239_v50 = vmul.f32 %v2459_v48, %v2396_v18 }
  0xec   :  { %v241_v53 = vmul.f32 %v2472_v52, %v2396_v18 }
  0xed   :  { %v234_v23 = vmul.f32 %v2399_v21, %v2401_v22  ;;  %v236_v42 = vmul.f32 %v2430_v37, %v2401_v22  ;;  %v238_v47 = vmul.f32 %v2448_v44, %v2401_v22  ;;  %v240_v51 = vmul.f32 %v2463_v49, %v2401_v22 }
  0xef   :  { %244 = vrot.lane.b32.xlu0 %v2401_v22, %s2348_s0  ;;  %2051 = vmatprep.mubr.msk.f32.mxu1 %vm152_vm0, %v234_v23 }
 0x15d   :  { %v247_v30 = vpop.permute.xlu0 %246 }
 0x15e   :  { %2047 = vmatprep.subr.msk.mxu1 %vm152_vm0, %v247_v30 }
 0x15f   :  { %2048 = vmatpush3.xpose.msk.msra.mxu1 %vm152_vm0, %v247_v30 }
 0x161   :  { %v245_v35 = vpop.permute.xlu0 %244 }
 0x162   :  { %2049 = vmatprep.subr.msk.mxu1 %vm152_vm0, %v245_v35 }
 0x163   :  { %2050 = vmatpush3.xpose.msk.msra.mxu1 %vm152_vm0, %v245_v35 }
 0x166   :  { %2052 = vmatmul.mubr.msk.f32.vlgmr.msra.gmra.mxu1 %vm152_vm0, %v235_v41  ;;  %v100_v41 = vshra.s32 %v92_v28, 3 }
 0x167   :  { %2054 = vmatprep.mubr.msk.f32.mxu1 %vm152_vm0, %v236_v42  ;;  %v93_v42 = vand.u32 15, %v2434_v39 }
 0x168   :  { %vm108_vm1 = vcmp.eq.s32.totalorder %v100_v41, %v2393_v16 }
 0x169   :  { %v2513_v39 = vsel %vm108_vm1, 0.0, %v2349_v0 }
 0x16a   :  { %2055 = vmatmul.mubr.msk.f32.gmra.mxu1 %vm152_vm0, %v237_v46 }
 0x16b   :  { %2057 = vmatprep.mubr.msk.f32.mxu1 %vm152_vm0, %v238_v47 }
 0x16e   :  { %2058 = vmatmul.mubr.msk.f32.gmra.mxu1 %vm152_vm0, %v239_v50 }
 0x16f   :  { %2060 = vmatprep.mubr.msk.f32.mxu1 %vm152_vm0, %v240_v51  ;;  %v2508_v51 = vsel %vm106_vm15, 0.0, %v2349_v0 }
 0x172   :  { %2061 = vmatmul.mubr.msk.f32.gmra.mxu1 %vm152_vm0, %v241_v53  ;;  %v101_v53 = vshra.s32 %v93_v42, 3 }
 0x174   :  { %vm109_vm2 = vcmp.eq.s32.totalorder %v101_v53, %v2393_v16 }
 0x175   :  { %v2518_v60 = vsel %vm109_vm2, 0.0, %v2349_v0 }
 0x226   :  { %v2053_v63 = vpop.f32.mrf.mxu1 }
 0x227   :  { %v382_v3 = vmul.f32 0.35355338, %v2053_v63 }
 0x228   :  { %v342_v4 = vpop.f32.mrf.mxu1 }
 0x229   :  { %v381_v6 = vmul.f32 0.35355338, %v342_v4  ;;  %v390_v8 = vadd.f32 %v382_v3, %v2482_v1 }
 0x22a   :  { %v2056_v14 = vpop.f32.mrf.mxu1 }
 0x22b   :  { %v384_v15 = vmul.f32 0.35355338, %v2056_v14  ;;  %v401_v17 = vsel %vm397_vm11, %v390_v8, -inf  ;;  %v389_v19 = vadd.f32 %v381_v6, %v2484_v5 }
 0x22c   :  { %402 = vmax.xlane.f32.xlu1 %v401_v17  ;;  %v352_v23 = vpop.f32.mrf.mxu1 }
 0x22d   :  { %v383_v26 = vmul.f32 0.35355338, %v352_v23  ;;  %v398_v31 = vsel %vm397_vm11, %v389_v19, -inf  ;;  %v392_v33 = vadd.f32 %v384_v15, %v2494_v25 }
 0x22e   :  { %v2059_v30 = vpop.f32.mrf.mxu1 }
 0x22f   :  { %v386_v29 = vmul.f32 0.35355338, %v2059_v30  ;;  %v391_v32 = vadd.f32 %v383_v26, %v2492_v24  ;;  %v407_v46 = vsel %vm397_vm11, %v392_v33, -inf }
 0x230   :  { %399 = vmax.xlane.f32.xlu1 %v398_v31  ;;  %v362_v35 = vpop.f32.mrf.mxu1 }
 0x231   :  { %v404_v40 = vsel %vm397_vm11, %v391_v32, -inf  ;;  %v385_v45 = vmul.f32 0.35355338, %v362_v35  ;;  %v394_v47 = vadd.f32 %v386_v29, %v2501_v38 }
 0x232   :  { %405 = vmax.xlane.f32.xlu0 %v404_v40  ;;  %v2062_v34 = vpop.f32.mrf.mxu1 }
 0x233   :  { %v413_v55 = vsel %vm397_vm11, %v394_v47, -inf  ;;  %v393_v56 = vadd.f32 %v385_v45, %v2508_v51  ;;  %v388_v57 = vmul.f32 0.35355338, %v2062_v34 }
 0x234   :  { %408 = vmax.xlane.f32.xlu1 %v407_v46  ;;  %v372_v50 = vpop.f32.mrf.mxu1 }
 0x235   :  { %v387_v54 = vmul.f32 0.35355338, %v372_v50  ;;  %v410_v58 = vsel %vm397_vm11, %v393_v56, -inf  ;;  %v396_v62 = vadd.f32 %v388_v57, %v2518_v60 }
 0x237   :  { %v395_v59 = vadd.f32 %v387_v54, %v2513_v39  ;;  %v419_v63 = vsel %vm397_vm11, %v396_v62, -inf }
 0x238   :  { %414 = vmax.xlane.f32.xlu1 %v413_v55 }
 0x239   :  { %v416_v61 = vsel %vm397_vm11, %v395_v59, -inf }
 0x23c   :  { %411 = vmax.xlane.f32.xlu1 %v410_v58 }
 0x240   :  { %417 = vmax.xlane.f32.xlu1 %v416_v61 }
 0x244   :  { %420 = vmax.xlane.f32.xlu1 %v419_v63 }
 0x2b5   :  { %v403_v3 = vpop.xlane.xlu1 %402 }
 0x2b6   :  { %v423_v4 = vsub.f32 %v390_v8, %v403_v3 }
 0x2b8   :  { %v432_v6 = vmul.f32 1.442695, %v423_v4 }
 0x2b9   :  { %v400_v10 = vpop.xlane.xlu1 %399 }
 0x2ba   :  { %2195 = vpow2.f32 %v432_v6  ;;  %v422_v13 = vsub.f32 %v389_v19, %v400_v10 }
 0x2bb   :  { %v406_v14 = vpop.xlane.xlu0 %405 }
 0x2bc   :  { %v430_v15 = vmul.f32 1.442695, %v422_v13  ;;  %v424_v17 = vsub.f32 %v391_v32, %v406_v14 }
 0x2bd   :  { %v409_v23 = vpop.xlane.xlu1 %408 }
 0x2be   :  { %2197 = vpow2.f32 %v430_v15  ;;  %v434_v0 = vmul.f32 1.442695, %v424_v17  ;;  %v425_v26 = vsub.f32 %v392_v33, %v409_v23 }
 0x2c0   :  { %2199 = vpow2.f32 %v434_v0  ;;  %v436_v27 = vmul.f32 1.442695, %v425_v26 }
 0x2c1   :  { %v415_v28 = vpop.xlane.xlu1 %414 }
 0x2c2   :  { %2201 = vpow2.f32 %v436_v27  ;;  %v427_v30 = vsub.f32 %v394_v47, %v415_v28 }
 0x2c4   :  { %v440_v29 = vmul.f32 1.442695, %v427_v30 }
 0x2c5   :  { %v412_v31 = vpop.xlane.xlu1 %411 }
 0x2c6   :  { %2203 = vpow2.f32 %v440_v29  ;;  %v426_v8 = vsub.f32 %v393_v56, %v412_v31 }
 0x2c7   :  { %v2196_v35 = vpop.eup %2195 }
 0x2c8   :  { %v438_v40 = vmul.f32 1.442695, %v426_v8  ;;  %v449_v19 = vsel %vm397_vm11, %v2196_v35, 0.0 }
 0x2c9   :  { %450 = vadd.xlane.f32.xlu1 %v449_v19  ;;  %v418_v41 = vpop.xlane.xlu1 %417 }
 0x2ca   :  { %2205 = vpow2.f32 %v438_v40  ;;  %v428_v32 = vsub.f32 %v395_v59, %v418_v41 }
 0x2cb   :  { %v2198_v42 = vpop.eup %2197 }
 0x2cc   :  { %v442_v34 = vmul.f32 1.442695, %v428_v32  ;;  %v446_v33 = vsel %vm397_vm11, %v2198_v42, 0.0 }
 0x2cd   :  { %v2200_v45 = vpop.eup %2199  ;;  %447 = vadd.xlane.f32.xlu1 %v446_v33  ;;  %v421_v46 = vpop.xlane.xlu1 %420 }
 0x2ce   :  { %2207 = vpow2.f32 %v442_v34  ;;  %v429_v47 = vsub.f32 %v396_v62, %v421_v46  ;;  %v452_v55 = vsel %vm397_vm11, %v2200_v45, 0.0 }
 0x2cf   :  { %v2202_v50 = vpop.eup %2201 }
 0x2d0   :  { %v444_v53 = vmul.f32 1.442695, %v429_v47  ;;  %v455_v54 = vsel %vm397_vm11, %v2202_v50, 0.0 }
 0x2d1   :  { %456 = vadd.xlane.f32.xlu0 %v455_v54  ;;  %453 = vadd.xlane.f32.xlu1 %v452_v55 }
 0x2d2   :  { %2209 = vpow2.f32 %v444_v53 }
 0x2d3   :  { %v2204_v56 = vpop.eup %2203 }
 0x2d4   :  { %v461_v57 = vsel %vm397_vm11, %v2204_v56, 0.0 }
 0x2d5   :  { %462 = vadd.xlane.f32.xlu0 %v461_v57 }
 0x2d7   :  { %v2206_v58 = vpop.eup %2205 }
 0x2d8   :  { %v458_v59 = vsel %vm397_vm11, %v2206_v58, 0.0 }
 0x2d9   :  { %459 = vadd.xlane.f32.xlu1 %v458_v59 }
 0x2db   :  { %v2208_v61 = vpop.eup %2207 }
 0x2dc   :  { %v464_v62 = vsel %vm397_vm11, %v2208_v61, 0.0 }
 0x2dd   :  { %465 = vadd.xlane.f32.xlu1 %v464_v62 }
 0x2df   :  { %v2210_v63 = vpop.eup %2209 }
 0x2e0   :  { %v467_v3 = vsel %vm397_vm11, %v2210_v63, 0.0 }
 0x2e1   :  { %468 = vadd.xlane.f32.xlu0 %v467_v3 }
 0x2ee   :  { %488 = vrot.lane.b32.xlu1 %v2396_v18, %s2345_s19 }
 0x2f7   :  { %486 = vrot.lane.b32.xlu0 %v2401_v22, %s2345_s19 }
 0x352   :  { %v451_v4 = vpop.xlane.xlu1 %450 }
 0x356   :  { %v448_v6 = vpop.xlane.xlu1 %447 }
 0x357   :  { %2211 = vrcp.f32 %v448_v6 }
 0x358   :  { %2213 = vrcp.f32 %v451_v4 }
 0x35a   :  { %v454_v10 = vpop.xlane.xlu1 %453  ;;  %v457_v13 = vpop.xlane.xlu0 %456 }
 0x35b   :  { %2215 = vrcp.f32 %v454_v10 }
 0x35c   :  { %2217 = vrcp.f32 %v457_v13 }
 0x35e   :  { %v463_v17 = vpop.xlane.xlu0 %462 }
 0x362   :  { %v460_v14 = vpop.xlane.xlu1 %459 }
 0x363   :  { %2219 = vrcp.f32 %v460_v14 }
 0x364   :  { %v2212_v15 = vpop.eup %2211  ;;  %2221 = vrcp.f32 %v463_v17 }
 0x365   :  { %v478_v23 = vmul.f32 %v2212_v15, %v2198_v42  ;;  %v2214_v26 = vpop.eup %2213 }
 0x366   :  { %v466_v0 = vpop.xlane.xlu1 %465  ;;  %v479_v30 = vmul.f32 %v2214_v26, %v2196_v35 }
 0x367   :  { %2067 = vmatprep.mubr.msk.f32.mxu0 %vm397_vm11, %v478_v23  ;;  %2223 = vrcp.f32 %v466_v0 }
 0x368   :  { %v2216_v27 = vpop.eup %2215 }
 0x369   :  { %v2218_v29 = vpop.eup %2217  ;;  %v480_v31 = vmul.f32 %v2216_v27, %v2200_v45  ;;  %v1941_v45 = vld [vmem:[#allocation5 + $0x18] sm:$0xff]  }
 0x36a   :  { %v469_v18 = vpop.xlane.xlu0 %468  ;;  %v489_v22 = vpop.permute.xlu1 %488  ;;  %v481_v40 = vmul.f32 %v2218_v29, %v2202_v50  ;;  %v1898_v46 = vunpack.c.h.bf16 %v1941_v45  ;;  %v1897_v47 = vunpack.c.l.bf16 %v1941_v45  ;;  %v1940_v50 = vld [vmem:[#allocation5 + $0x10] sm:$0xff]  }
 0x36b   :  { %2225 = vrcp.f32 %v469_v18  ;;  %2063 = vmatprep.subr.mxu0 %v489_v22  ;;  %v1894_v53 = vunpack.c.h.bf16 %v1940_v50  ;;  %v1893_v54 = vunpack.c.l.bf16 %v1940_v50 }
 0x36c   :  { %2064 = vmatpush3.msra.mxu0 %v489_v22  ;;  %2079 = vmatprep.subr.mxu1 %v1898_v46 }
 0x36d   :  { %2080 = vmatpush3.msra.mxu1 %v1898_v46 }
 0x36e   :  { %v487_v28 = vpop.permute.xlu0 %486  ;;  %2081 = vmatprep.subr.mxu1 %v1897_v47 }
 0x36f   :  { %2065 = vmatprep.subr.mxu0 %v487_v28  ;;  %2082 = vmatpush3.msra.mxu1 %v1897_v47 }
 0x370   :  { %2066 = vmatpush3.msra.mxu0 %v487_v28  ;;  %v2220_v8 = vpop.eup %2219  ;;  %2083 = vmatprep.subr.mxu1 %v1894_v53  ;;  %v637_v28 = vsub.s32 1, %v2383_v9 }
 0x371   :  { %2068 = vmatmul.mubr.msk.f32.vlgmr.msra.gmra.mxu0 %vm397_vm11, %v479_v30  ;;  %v2222_v19 = vpop.eup %2221  ;;  %v482_v41 = vmul.f32 %v2220_v8, %v2206_v58  ;;  %2084 = vmatpush3.msra.mxu1 %v1894_v53 }
 0x372   :  { %2070 = vmatprep.mubr.msk.f32.mxu0 %vm397_vm11, %v480_v31  ;;  %v483_v42 = vmul.f32 %v2222_v19, %v2204_v56  ;;  %2085 = vmatprep.subr.mxu1 %v1893_v54  ;;  %v638_v30 = vrot.slane %v2385_v11, %v637_v28 }
 0x373   :  { %2086 = vmatpush3.msra.mxu1 %v1893_v54 }
 0x374   :  { %v2224_v32 = vpop.eup %2223 }
 0x375   :  { %2071 = vmatmul.mubr.msk.f32.gmra.mxu0 %vm397_vm11, %v481_v40  ;;  %v484_v33 = vmul.f32 %v2224_v32, %v2208_v61 }
 0x376   :  { %2073 = vmatprep.mubr.msk.f32.mxu0 %vm397_vm11, %v482_v41 }
 0x378   :  { %v2226_v34 = vpop.eup %2225 }
 0x379   :  { %2074 = vmatmul.mubr.msk.f32.gmra.mxu0 %vm397_vm11, %v483_v42  ;;  %v485_v35 = vmul.f32 %v2226_v34, %v2210_v63 }
 0x37a   :  { %2076 = vmatprep.mubr.msk.f32.mxu0 %vm397_vm11, %v484_v33 }
 0x37d   :  { %2077 = vmatmul.mubr.msk.f32.gmra.mxu0 %vm397_vm11, %v485_v35 }
 0x431   :  { %v2069_v55 = vpop.f32.mrf.mxu0 }
 0x432   :  { %v622_v6 = vmul.f32 %v2069_v55, %v2426_v36  ;;  %v1943_v55 = vld [vmem:[#allocation5 + $0x28] sm:$0xff]  }
 0x433   :  { %v582_v56 = vpop.f32.mrf.mxu0 }
 0x434   :  { %v621_v3 = vmul.f32 %v2399_v21, %v582_v56  ;;  %v1906_v56 = vunpack.c.h.bf16 %v1943_v55 }
 0x435   :  { %v2072_v57 = vpop.f32.mrf.mxu0 }
 0x436   :  { %v624_v62 = vmul.f32 %v2072_v57, %v2444_v43  ;;  %v1905_v57 = vunpack.c.l.bf16 %v1943_v55  ;;  %2090 = vmatprep.subr.mxu0 %v1906_v56 }
 0x437   :  { %v592_v58 = vpop.f32.mrf.mxu0  ;;  %2091 = vmatpush3.msra.mxu0 %v1906_v56  ;;  %v1945_v56 = vld [vmem:[#allocation5 + $0x40] sm:$0xff]  }
 0x438   :  { %v623_v61 = vmul.f32 %v2430_v37, %v592_v58  ;;  %v630_v15 = vadd.f32 %v624_v62, %v622_v6  ;;  %2092 = vmatprep.subr.mxu0 %v1905_v57 }
 0x439   :  { %v2075_v59 = vpop.f32.mrf.mxu0  ;;  %2093 = vmatpush3.msra.mxu0 %v1905_v57  ;;  %v1944_v57 = vld [vmem:[#allocation5 + $0x38] sm:$0xff]  }
 0x43a   :  { %v626_v10 = vmul.f32 %v2075_v59, %v2459_v48  ;;  %v629_v14 = vadd.f32 %v623_v61, %v621_v3 }
 0x43b   :  { %v602_v63 = vpop.f32.mrf.mxu0 }
 0x43c   :  { %v625_v4 = vmul.f32 %v2448_v44, %v602_v63  ;;  %v632_v22 = vadd.f32 %v630_v15, %v626_v10  ;;  %v751_v10 = vsub.s32 2, %v2383_v9  ;;  %v757_v15 = vsub.s32 3, %v2383_v9 }
 0x43d   :  { %v2078_v13 = vpop.f32.mrf.mxu0 }
 0x43e   :  { %v628_v17 = vmul.f32 %v2078_v13, %v2472_v52  ;;  %v631_v0 = vadd.f32 %v629_v14, %v625_v4  ;;  %v752_v14 = vrot.slane %v2385_v11, %v751_v10 }
 0x43f   :  { %v612_v23 = vpop.f32.mrf.mxu0 }
 0x440   :  { %v627_v18 = vmul.f32 %v2463_v49, %v612_v23  ;;  %v634_v27 = vadd.f32 %v632_v22, %v628_v17  ;;  %v758_v22 = vrot.slane %v2385_v11, %v757_v15 }
 0x442   :  { %v633_v26 = vadd.f32 %v631_v0, %v627_v18 }
 0x444   :  { %2087 = vmatprep.mubr.msk.f32.mxu1 %vm152_vm0, %v633_v26 }
 0x445   :  { %2088 = vmatmul.mubr.msk.f32.vlgmr.msra.gmra.mxu1 %vm152_vm0, %v634_v27 }
 0x505   :  { %v2089_v29 = vpop.f32.mrf.mxu1 }
 0x506   :  { %v717_v31 = vadd.f32 %v2089_v29, %v638_v30  ;;  %v763_v29 = vsub.s32 4, %v2383_v9 }
 0x507   :  { %v711_v8 = vpop.f32.mrf.mxu1 }
 0x508   :  { %v712_v40 = vadd.f32 %v711_v8, %v638_v30  ;;  %v721_v19 = vadd.f32 %v717_v31, %v2379_v7  ;;  %v764_v31 = vrot.slane %v2385_v11, %v763_v29 }
 0x50a   :  { %v725_v41 = vsel %vm152_vm0, %v721_v19, 0.0  ;;  %v720_v32 = vadd.f32 %v712_v40, %v2375_v2  ;;  %v1942_v2 = vld [vmem:[#allocation5 + $0x20] sm:$0xff]  }
 0x50b   :  { %726 = vadd.xlane.f32.xlu0 %v725_v41  ;;  %v1902_v58 = vunpack.c.h.bf16 %v1942_v2  ;;  %v1901_v59 = vunpack.c.l.bf16 %v1942_v2 }
 0x50c   :  { %v722_v42 = vsel %vm152_vm0, %v720_v32, 0.0 }
 0x50d   :  { %723 = vadd.xlane.f32.xlu1 %v722_v42  ;;  %2094 = vmatprep.subr.mxu0 %v1902_v58 }
 0x50e   :  { %2095 = vmatpush3.msra.mxu0 %v1902_v58  ;;  %v1914_v58 = vunpack.c.h.bf16 %v1945_v56 }
 0x50f   :  { %2096 = vmatprep.subr.mxu0 %v1901_v59 }
 0x510   :  { %2097 = vmatpush3.msra.mxu0 %v1901_v59  ;;  %v1913_v59 = vunpack.c.l.bf16 %v1945_v56  ;;  %2101 = vmatprep.subr.mxu1 %v1914_v58 }
 0x511   :  { %2102 = vmatpush3.msra.mxu1 %v1914_v58 }
 0x512   :  { %2103 = vmatprep.subr.mxu1 %v1913_v59 }
 0x513   :  { %2104 = vmatpush3.msra.mxu1 %v1913_v59 }
 0x594   :  { %v727_v34 = vpop.xlane.xlu0 %726 }
 0x595   :  { %v730_v33 = vmul.f32 0.03125, %v727_v34 }
 0x596   :  { %v724_v35 = vpop.xlane.xlu1 %723 }
 0x597   :  { %v732_v45 = vsub.f32 %v721_v19, %v730_v33  ;;  %v729_v46 = vmul.f32 0.03125, %v724_v35 }
 0x599   :  { %v731_v47 = vsub.f32 %v720_v32, %v729_v46  ;;  %v734_v50 = vmul.f32 %v732_v45, %v732_v45 }
 0x59b   :  { %v738_v53 = vsel %vm152_vm0, %v734_v50, 0.0  ;;  %v733_v54 = vmul.f32 %v731_v47, %v731_v47 }
 0x59c   :  { %739 = vadd.xlane.f32.xlu0 %v738_v53 }
 0x59d   :  { %v735_v7 = vsel %vm152_vm0, %v733_v54, 0.0 }
 0x59e   :  { %736 = vadd.xlane.f32.xlu1 %v735_v7 }
 0x625   :  { %v740_v61 = vpop.xlane.xlu0 %739 }
 0x626   :  { %v742_v62 = vmul.f32 0.03125, %v740_v61  ;;  %v1910_v61 = vunpack.c.h.bf16 %v1944_v57 }
 0x627   :  { %v737_v63 = vpop.xlane.xlu1 %736 }
 0x628   :  { %v744_v3 = vadd.f32 1e-05, %v742_v62  ;;  %v741_v4 = vmul.f32 0.03125, %v737_v63  ;;  %v1909_v62 = vunpack.c.l.bf16 %v1944_v57  ;;  %2105 = vmatprep.subr.mxu1 %v1910_v61 }
 0x629   :  { %2106 = vmatpush3.msra.mxu1 %v1910_v61 }
 0x62a   :  { %2227 = vrsqrt.f32 %v744_v3  ;;  %v743_v6 = vadd.f32 1e-05, %v741_v4  ;;  %2107 = vmatprep.subr.mxu1 %v1909_v62 }
 0x62b   :  { %2108 = vmatpush3.msra.mxu1 %v1909_v62 }
 0x62c   :  { %2229 = vrsqrt.f32 %v743_v6 }
 0x637   :  { %v2228_v13 = vpop.eup %2227 }
 0x638   :  { %v748_v17 = vmul.f32 %v2228_v13, %v732_v45 }
 0x639   :  { %v2230_v23 = vpop.eup %2229 }
 0x63a   :  { %v747_v0 = vmul.f32 %v2230_v23, %v731_v47  ;;  %v754_v18 = vmul.f32 %v752_v14, %v748_v17  ;;  %v876_v17 = vsub.s32 5, %v2383_v9 }
 0x63c   :  { %v753_v26 = vmul.f32 %v752_v14, %v747_v0  ;;  %v760_v30 = vadd.f32 %v758_v22, %v754_v18  ;;  %v877_v0 = vrot.slane %v2385_v11, %v876_v17  ;;  %v882_v18 = vsub.s32 6, %v2383_v9 }
 0x63e   :  { %v759_v27 = vadd.f32 %v758_v22, %v753_v26 }
 0x640   :  { %2098 = vmatprep.mubr.msk.f32.mxu0 %vm152_vm0, %v759_v27 }
 0x641   :  { %2099 = vmatmul.mubr.msk.f32.vlgmr.msra.gmra.mxu0 %vm152_vm0, %v760_v30 }
 0x701   :  { %v2100_v8 = vpop.f32.mrf.mxu0 }
 0x702   :  { %v843_v40 = vadd.f32 %v2100_v8, %v764_v31 }
 0x703   :  { %v837_v19 = vpop.f32.mrf.mxu0 }
 0x704   :  { %v847_v41 = vmax.f32 %v843_v40, 0.0  ;;  %v838_v32 = vadd.f32 %v837_v19, %v764_v31  ;;  %v883_v31 = vrot.slane %v2385_v11, %v882_v18 }
 0x706   :  { %v846_v42 = vmax.f32 %v838_v32, 0.0  ;;  %v851_v34 = vsel %vm152_vm0, %v847_v41, 0.0 }
 0x707   :  { %852 = vadd.xlane.f32.xlu0 %v851_v34 }
 0x708   :  { %v848_v33 = vsel %vm152_vm0, %v846_v42, 0.0 }
 0x709   :  { %849 = vadd.xlane.f32.xlu1 %v848_v33 }
 0x790   :  { %v853_v35 = vpop.xlane.xlu0 %852 }
 0x791   :  { %v855_v45 = vmul.f32 0.03125, %v853_v35 }
 0x792   :  { %v850_v46 = vpop.xlane.xlu1 %849 }
 0x793   :  { %v857_v47 = vsub.f32 %v847_v41, %v855_v45  ;;  %v854_v50 = vmul.f32 0.03125, %v850_v46  ;;  %v910_v41 = vld [vmem:[#allocation5 + $0x68] sm:$0xf] }
 0x794   :  { %v2597_v32 = vunpack.c.l.bf16 %v910_v41 }
 0x795   :  { %v856_v53 = vsub.f32 %v846_v42, %v854_v50  ;;  %v859_v54 = vmul.f32 %v857_v47, %v857_v47 }
 0x796   :  { %v915_v42 = vrot.slane %v2597_v32, %v2388_v12 }
 0x797   :  { %v863_v7 = vsel %vm152_vm0, %v859_v54, 0.0  ;;  %v858_v55 = vmul.f32 %v856_v53, %v856_v53 }
 0x798   :  { %864 = vadd.xlane.f32.xlu0 %v863_v7 }
 0x799   :  { %v860_v2 = vsel %vm152_vm0, %v858_v55, 0.0 }
 0x79a   :  { %861 = vadd.xlane.f32.xlu1 %v860_v2 }
 0x821   :  { %v865_v63 = vpop.xlane.xlu0 %864 }
 0x822   :  { %v867_v3 = vmul.f32 0.03125, %v865_v63 }
 0x823   :  { %v862_v4 = vpop.xlane.xlu1 %861 }
 0x824   :  { %v869_v6 = vadd.f32 1e-05, %v867_v3  ;;  %v866_v13 = vmul.f32 0.03125, %v862_v4 }
 0x826   :  { %2231 = vrsqrt.f32 %v869_v6  ;;  %v868_v14 = vadd.f32 1e-05, %v866_v13 }
 0x828   :  { %2233 = vrsqrt.f32 %v868_v14 }
 0x833   :  { %v2232_v23 = vpop.eup %2231 }
 0x834   :  { %v873_v22 = vmul.f32 %v2232_v23, %v857_v47 }
 0x835   :  { %v2234_v26 = vpop.eup %2233 }
 0x836   :  { %v872_v27 = vmul.f32 %v2234_v26, %v856_v53  ;;  %v879_v30 = vmul.f32 %v877_v0, %v873_v22 }
 0x838   :  { %v878_v8 = vmul.f32 %v877_v0, %v872_v27  ;;  %v2591_v19 = vadd.f32 %v883_v31, %v879_v30 }
 0x83a   :  { %v2589_v40 = vadd.f32 %v883_v31, %v878_v8 }
 0x83c   :  { %2109 = vmatprep.mubr.msk.f32.mxu1 %vm152_vm0, %v2589_v40 }
 0x83d   :  { %2110 = vmatmul.mubr.msk.f32.vlgmr.msra.gmra.mxu1 %vm152_vm0, %v2591_v19 }
 0x8fd   :  { %v2111_v34 = vpop.f32.mrf.mxu1 }
 0x8fe   :  { %v2601_v33 = vadd.f32 %v2111_v34, %v915_v42 }
 0x8ff   :  { %v988_v11 = vpop.f32.mrf.mxu1 }
 0x900   :  { %v2603_v35 = vadd.f32 %v988_v11, %v915_v42  ;;  %1009 = vrot.lane.b32.xlu1 %v2601_v33, %s2348_s0  ;;  %v998_v50 = vmul.f32 %v2426_v36, %v2601_v33  ;;  %v1000_v54 = vmul.f32 %v2444_v43, %v2601_v33  ;;  %v1002_v55 = vmul.f32 %v2459_v48, %v2601_v33 }
 0x901   :  { %v1004_v56 = vmul.f32 %v2472_v52, %v2601_v33 }
 0x902   :  { %1007 = vrot.lane.b32.xlu0 %v2603_v35, %s2348_s0  ;;  %v997_v45 = vmul.f32 %v2399_v21, %v2603_v35  ;;  %v999_v53 = vmul.f32 %v2430_v37, %v2603_v35  ;;  %v1001_v7 = vmul.f32 %v2448_v44, %v2603_v35  ;;  %v1003_v2 = vmul.f32 %v2463_v49, %v2603_v35 }
 0x904   :  { %2116 = vmatprep.mubr.msk.f32.mxu0 %vm152_vm0, %v997_v45 }
 0x972   :  { %v1010_v46 = vpop.permute.xlu1 %1009 }
 0x973   :  { %2112 = vmatprep.subr.msk.mxu0 %vm152_vm0, %v1010_v46 }
 0x974   :  { %2113 = vmatpush3.xpose.msk.msra.mxu0 %vm152_vm0, %v1010_v46  ;;  %v1008_v47 = vpop.permute.xlu0 %1007 }
 0x975   :  { %2114 = vmatprep.subr.msk.mxu0 %vm152_vm0, %v1008_v47 }
 0x978   :  { %2115 = vmatpush3.xpose.msk.msra.mxu0 %vm152_vm0, %v1008_v47 }
 0x97b   :  { %2117 = vmatmul.mubr.msk.f32.vlgmr.msra.gmra.mxu0 %vm152_vm0, %v998_v50 }
 0x97c   :  { %2119 = vmatprep.mubr.msk.f32.mxu0 %vm152_vm0, %v999_v53 }
 0x97f   :  { %2120 = vmatmul.mubr.msk.f32.gmra.mxu0 %vm152_vm0, %v1000_v54 }
 0x980   :  { %2122 = vmatprep.mubr.msk.f32.mxu0 %vm152_vm0, %v1001_v7 }
 0x983   :  { %2123 = vmatmul.mubr.msk.f32.gmra.mxu0 %vm152_vm0, %v1002_v55 }
 0x984   :  { %2125 = vmatprep.mubr.msk.f32.mxu0 %vm152_vm0, %v1003_v2 }
 0x987   :  { %2126 = vmatmul.mubr.msk.f32.gmra.mxu0 %vm152_vm0, %v1004_v56 }
 0xa3b   :  { %v2118_v57 = vpop.f32.mrf.mxu0 }
 0xa3c   :  { %v1145_v58 = vmul.f32 0.35355338, %v2118_v57 }
 0xa3d   :  { %v1105_v59 = vpop.f32.mrf.mxu0 }
 0xa3e   :  { %v1144_v61 = vmul.f32 0.35355338, %v1105_v59  ;;  %v1153_v62 = vadd.f32 %v1145_v58, %v2482_v1 }
 0xa3f   :  { %v2121_v63 = vpop.f32.mrf.mxu0 }
 0xa40   :  { %v1147_v3 = vmul.f32 0.35355338, %v2121_v63  ;;  %v1163_v4 = vsel %vm397_vm11, %v1153_v62, -inf  ;;  %v1152_v6 = vadd.f32 %v1144_v61, %v2484_v5 }
 0xa41   :  { %1164 = vmax.xlane.f32.xlu0 %v1163_v4  ;;  %v1115_v13 = vpop.f32.mrf.mxu0 }
 0xa42   :  { %v1146_v14 = vmul.f32 0.35355338, %v1115_v13  ;;  %v1160_v23 = vsel %vm397_vm11, %v1152_v6, -inf  ;;  %v1155_v0 = vadd.f32 %v1147_v3, %v2494_v25 }
 0xa43   :  { %1161 = vmax.xlane.f32.xlu1 %v1160_v23  ;;  %v2124_v22 = vpop.f32.mrf.mxu0 }
 0xa44   :  { %v1149_v26 = vmul.f32 0.35355338, %v2124_v22  ;;  %v1169_v27 = vsel %vm397_vm11, %v1155_v0, -inf  ;;  %v1154_v1 = vadd.f32 %v1146_v14, %v2492_v24 }
 0xa45   :  { %1170 = vmax.xlane.f32.xlu0 %v1169_v27  ;;  %v1125_v30 = vpop.f32.mrf.mxu0 }
 0xa46   :  { %v1148_v31 = vmul.f32 0.35355338, %v1125_v30  ;;  %v1166_v8 = vsel %vm397_vm11, %v1154_v1, -inf  ;;  %v1157_v5 = vadd.f32 %v1149_v26, %v2501_v38 }
 0xa47   :  { %1167 = vmax.xlane.f32.xlu1 %v1166_v8  ;;  %v2127_v41 = vpop.f32.mrf.mxu0 }
 0xa48   :  { %v1151_v42 = vmul.f32 0.35355338, %v2127_v41  ;;  %v1175_v34 = vsel %vm397_vm11, %v1157_v5, -inf  ;;  %v1156_v25 = vadd.f32 %v1148_v31, %v2508_v51 }
 0xa49   :  { %1176 = vmax.xlane.f32.xlu0 %v1175_v34  ;;  %v1135_v11 = vpop.f32.mrf.mxu0 }
 0xa4a   :  { %v1150_v45 = vmul.f32 0.35355338, %v1135_v11  ;;  %v1172_v46 = vsel %vm397_vm11, %v1156_v25, -inf  ;;  %v1159_v24 = vadd.f32 %v1151_v42, %v2518_v60 }
 0xa4b   :  { %1173 = vmax.xlane.f32.xlu1 %v1172_v46 }
 0xa4c   :  { %v1181_v47 = vsel %vm397_vm11, %v1159_v24, -inf  ;;  %v1158_v50 = vadd.f32 %v1150_v45, %v2513_v39 }
 0xa4d   :  { %1182 = vmax.xlane.f32.xlu0 %v1181_v47 }
 0xa4e   :  { %v1178_v38 = vsel %vm397_vm11, %v1158_v50, -inf }
 0xa4f   :  { %1179 = vmax.xlane.f32.xlu1 %v1178_v38 }
 0xaca   :  { %v1165_v53 = vpop.xlane.xlu0 %1164 }
 0xacb   :  { %v1185_v54 = vsub.f32 %v1153_v62, %v1165_v53 }
 0xacc   :  { %v1162_v7 = vpop.xlane.xlu1 %1161 }
 0xacd   :  { %v1194_v51 = vmul.f32 1.442695, %v1185_v54  ;;  %v1184_v55 = vsub.f32 %v1152_v6, %v1162_v7 }
 0xace   :  { %v1171_v2 = vpop.xlane.xlu0 %1170 }
 0xacf   :  { %2235 = vpow2.f32 %v1194_v51  ;;  %v1192_v56 = vmul.f32 1.442695, %v1184_v55  ;;  %v1187_v57 = vsub.f32 %v1155_v0, %v1171_v2 }
 0xad0   :  { %v1168_v58 = vpop.xlane.xlu1 %1167 }
 0xad1   :  { %2237 = vpow2.f32 %v1192_v56  ;;  %v1198_v60 = vmul.f32 1.442695, %v1187_v57  ;;  %v1186_v59 = vsub.f32 %v1154_v1, %v1168_v58 }
 0xad2   :  { %v1177_v61 = vpop.xlane.xlu0 %1176 }
 0xad3   :  { %2239 = vpow2.f32 %v1198_v60  ;;  %v1196_v39 = vmul.f32 1.442695, %v1186_v59  ;;  %v1189_v63 = vsub.f32 %v1157_v5, %v1177_v61 }
 0xad4   :  { %v1174_v3 = vpop.xlane.xlu1 %1173 }
 0xad5   :  { %2241 = vpow2.f32 %v1196_v39  ;;  %v1202_v4 = vmul.f32 1.442695, %v1189_v63  ;;  %v1188_v13 = vsub.f32 %v1156_v25, %v1174_v3 }
 0xad6   :  { %v1183_v62 = vpop.xlane.xlu0 %1182 }
 0xad7   :  { %2243 = vpow2.f32 %v1202_v4  ;;  %v1200_v14 = vmul.f32 1.442695, %v1188_v13  ;;  %v1191_v6 = vsub.f32 %v1159_v24, %v1183_v62 }
 0xad8   :  { %v1180_v23 = vpop.xlane.xlu1 %1179 }
 0xad9   :  { %2245 = vpow2.f32 %v1200_v14  ;;  %v1206_v22 = vmul.f32 1.442695, %v1191_v6  ;;  %v1190_v0 = vsub.f32 %v1158_v50, %v1180_v23 }
 0xadb   :  { %2247 = vpow2.f32 %v1206_v22  ;;  %v1204_v26 = vmul.f32 1.442695, %v1190_v0 }
 0xadc   :  { %v2236_v27 = vpop.eup %2235 }
 0xadd   :  { %2249 = vpow2.f32 %v1204_v26  ;;  %v1211_v1 = vsel %vm397_vm11, %v2236_v27, 0.0  ;;  %v1947_v26 = vld [vmem:[#allocation5 + $0x50] sm:$0xff]  }
 0xade   :  { %v2238_v30 = vpop.eup %2237  ;;  %1212 = vadd.xlane.f32.xlu0 %v1211_v1  ;;  %v1921_v1 = vunpack.c.l.bf16 %v1947_v26 }
 0xadf   :  { %v1208_v31 = vsel %vm397_vm11, %v2238_v30, 0.0 }
 0xae0   :  { %v2240_v8 = vpop.eup %2239  ;;  %1209 = vadd.xlane.f32.xlu1 %v1208_v31 }
 0xae1   :  { %v1217_v5 = vsel %vm397_vm11, %v2240_v8, 0.0 }
 0xae2   :  { %v2242_v41 = vpop.eup %2241  ;;  %1218 = vadd.xlane.f32.xlu0 %v1217_v5 }
 0xae3   :  { %v1214_v42 = vsel %vm397_vm11, %v2242_v41, 0.0 }
 0xae4   :  { %v2244_v34 = vpop.eup %2243  ;;  %1215 = vadd.xlane.f32.xlu1 %v1214_v42 }
 0xae5   :  { %v1223_v25 = vsel %vm397_vm11, %v2244_v34, 0.0 }
 0xae6   :  { %v2246_v11 = vpop.eup %2245  ;;  %1224 = vadd.xlane.f32.xlu0 %v1223_v25 }
 0xae7   :  { %v1220_v45 = vsel %vm397_vm11, %v2246_v11, 0.0 }
 0xae8   :  { %v2248_v46 = vpop.eup %2247  ;;  %1221 = vadd.xlane.f32.xlu1 %v1220_v45 }
 0xae9   :  { %v1229_v24 = vsel %vm397_vm11, %v2248_v46, 0.0 }
 0xaea   :  { %v2250_v47 = vpop.eup %2249  ;;  %1230 = vadd.xlane.f32.xlu0 %v1229_v24 }
 0xaeb   :  { %v1226_v50 = vsel %vm397_vm11, %v2250_v47, 0.0 }
 0xaec   :  { %1227 = vadd.xlane.f32.xlu1 %v1226_v50 }
 0xafd   :  { %1250 = vrot.lane.b32.xlu1 %v2601_v33, %s2345_s19 }
 0xb00   :  { %1248 = vrot.lane.b32.xlu0 %v2603_v35, %s2345_s19 }
 0xb67   :  { %v1213_v38 = vpop.xlane.xlu0 %1212 }
 0xb69   :  { %v1210_v53 = vpop.xlane.xlu1 %1209 }
 0xb6a   :  { %2251 = vrcp.f32 %v1210_v53 }
 0xb6b   :  { %v1219_v54 = vpop.xlane.xlu0 %1218  ;;  %2253 = vrcp.f32 %v1213_v38 }
 0xb6d   :  { %v1216_v7 = vpop.xlane.xlu1 %1215 }
 0xb6e   :  { %2255 = vrcp.f32 %v1216_v7 }
 0xb6f   :  { %v1225_v51 = vpop.xlane.xlu0 %1224  ;;  %2257 = vrcp.f32 %v1219_v54 }
 0xb71   :  { %v1222_v55 = vpop.xlane.xlu1 %1221 }
 0xb72   :  { %2259 = vrcp.f32 %v1222_v55 }
 0xb73   :  { %2261 = vrcp.f32 %v1225_v51  ;;  %v1231_v2 = vpop.xlane.xlu0 %1230 }
 0xb75   :  { %v1228_v56 = vpop.xlane.xlu1 %1227 }
 0xb76   :  { %2263 = vrcp.f32 %v1228_v56 }
 0xb77   :  { %v2252_v57 = vpop.eup %2251  ;;  %2265 = vrcp.f32 %v1231_v2  ;;  %v1249_v59 = vpop.permute.xlu0 %1248 }
 0xb78   :  { %v1240_v33 = vmul.f32 %v2252_v57, %v2238_v30  ;;  %v2254_v58 = vpop.eup %2253  ;;  %v1946_v30 = vld [vmem:[#allocation5 + $0x48] sm:$0xff]  }
 0xb79   :  { %v1251_v35 = vpop.permute.xlu1 %1250  ;;  %v1241_v61 = vmul.f32 %v2254_v58, %v2236_v27  ;;  %v1922_v27 = vunpack.c.h.bf16 %v1947_v26  ;;  %v1918_v31 = vunpack.c.h.bf16 %v1946_v30 }
 0xb7a   :  { %2128 = vmatprep.subr.mxu1 %v1251_v35  ;;  %2132 = vmatprep.mubr.msk.f32.mxu1 %vm397_vm11, %v1240_v33 }
 0xb7b   :  { %v2256_v60 = vpop.eup %2255  ;;  %2129 = vmatpush3.msra.mxu1 %v1251_v35  ;;  %2144 = vmatprep.subr.mxu0 %v1922_v27 }
 0xb7c   :  { %2130 = vmatprep.subr.mxu1 %v1249_v59  ;;  %v1242_v39 = vmul.f32 %v2256_v60, %v2242_v41  ;;  %v2258_v63 = vpop.eup %2257  ;;  %2145 = vmatpush3.msra.mxu0 %v1922_v27 }
 0xb7d   :  { %2131 = vmatpush3.msra.mxu1 %v1249_v59  ;;  %v1243_v4 = vmul.f32 %v2258_v63, %v2240_v8  ;;  %2146 = vmatprep.subr.mxu0 %v1921_v1  ;;  %v1917_v8 = vunpack.c.l.bf16 %v1946_v30 }
 0xb7e   :  { %2133 = vmatmul.mubr.msk.f32.vlgmr.msra.gmra.mxu1 %vm397_vm11, %v1241_v61  ;;  %2147 = vmatpush3.msra.mxu0 %v1921_v1 }
 0xb7f   :  { %v2260_v3 = vpop.eup %2259  ;;  %2135 = vmatprep.mubr.msk.f32.mxu1 %vm397_vm11, %v1242_v39  ;;  %2148 = vmatprep.subr.mxu0 %v1918_v31 }
 0xb80   :  { %v1244_v13 = vmul.f32 %v2260_v3, %v2246_v11  ;;  %v2262_v62 = vpop.eup %2261  ;;  %2149 = vmatpush3.msra.mxu0 %v1918_v31 }
 0xb81   :  { %v1245_v6 = vmul.f32 %v2262_v62, %v2244_v34  ;;  %2150 = vmatprep.subr.mxu0 %v1917_v8  ;;  %v1949_v62 = vld [vmem:[#allocation5 + $0x60] sm:$0xff]  }
 0xb82   :  { %2136 = vmatmul.mubr.msk.f32.gmra.mxu1 %vm397_vm11, %v1243_v4  ;;  %2151 = vmatpush3.msra.mxu0 %v1917_v8 }
 0xb83   :  { %v2264_v14 = vpop.eup %2263  ;;  %2138 = vmatprep.mubr.msk.f32.mxu1 %vm397_vm11, %v1244_v13  ;;  %2166 = vmatprep.subr.mxu0 %v2347_v20 }
 0xb84   :  { %v1246_v23 = vmul.f32 %v2264_v14, %v2250_v47  ;;  %v2266_v22 = vpop.eup %2265  ;;  %v1930_v14 = vunpack.c.h.bf16 %v1949_v62 }
 0xb85   :  { %v1247_v0 = vmul.f32 %v2266_v22, %v2248_v46 }
 0xb86   :  { %2139 = vmatmul.mubr.msk.f32.gmra.mxu1 %vm397_vm11, %v1245_v6  ;;  %v1929_v6 = vunpack.c.l.bf16 %v1949_v62  ;;  %2155 = vmatprep.subr.mxu1 %v1930_v14 }
 0xb87   :  { %2141 = vmatprep.mubr.msk.f32.mxu1 %vm397_vm11, %v1246_v23  ;;  %2156 = vmatpush3.msra.mxu1 %v1930_v14  ;;  %v1832_v14 = vsel %vm118_vm4, 1.0, %v2347_v20 }
 0xb88   :  { %2157 = vmatprep.subr.mxu1 %v1929_v6 }
 0xb89   :  { %2158 = vmatpush3.msra.mxu1 %v1929_v6 }
 0xb8a   :  { %2142 = vmatmul.mubr.msk.f32.gmra.mxu1 %vm397_vm11, %v1247_v0 }
 0xc3e   :  { %v2134_v5 = vpop.f32.mrf.mxu1 }
 0xc3f   :  { %v1384_v50 = vmul.f32 %v2134_v5, %v2426_v36  ;;  %v1513_v5 = vrot.slane %v2597_v32, %v751_v10 }
 0xc40   :  { %v1344_v41 = vpop.f32.mrf.mxu1 }
 0xc41   :  { %v1383_v24 = vmul.f32 %v2399_v21, %v1344_v41  ;;  %v1400_v21 = vrot.slane %v2597_v32, %v637_v28 }
 0xc42   :  { %v2137_v42 = vpop.f32.mrf.mxu1 }
 0xc43   :  { %v1386_v45 = vmul.f32 %v2137_v42, %v2444_v43 }
 0xc44   :  { %v1354_v34 = vpop.f32.mrf.mxu1 }
 0xc45   :  { %v1385_v11 = vmul.f32 %v2430_v37, %v1354_v34  ;;  %v1392_v7 = vadd.f32 %v1386_v45, %v1384_v50 }
 0xc46   :  { %v2140_v25 = vpop.f32.mrf.mxu1 }
 0xc47   :  { %v1388_v38 = vmul.f32 %v2140_v25, %v2459_v48  ;;  %v1391_v54 = vadd.f32 %v1385_v11, %v1383_v24  ;;  %v1519_v11 = vrot.slane %v2597_v32, %v757_v15 }
 0xc48   :  { %v1364_v46 = vpop.f32.mrf.mxu1 }
 0xc49   :  { %v1387_v47 = vmul.f32 %v2448_v44, %v1364_v46  ;;  %v1394_v56 = vadd.f32 %v1392_v7, %v1388_v38 }
 0xc4a   :  { %v2143_v53 = vpop.f32.mrf.mxu1 }
 0xc4b   :  { %v1390_v51 = vmul.f32 %v2143_v53, %v2472_v52  ;;  %v1393_v2 = vadd.f32 %v1391_v54, %v1387_v47  ;;  %v1525_v47 = vrot.slane %v2597_v32, %v763_v29 }
 0xc4c   :  { %v1374_v55 = vpop.f32.mrf.mxu1 }
 0xc4d   :  { %v1389_v37 = vmul.f32 %v2463_v49, %v1374_v55  ;;  %v1396_v57 = vadd.f32 %v1394_v56, %v1390_v51 }
 0xc4f   :  { %v1395_v43 = vadd.f32 %v1393_v2, %v1389_v37 }
 0xc51   :  { %2152 = vmatprep.mubr.msk.f32.mxu0 %vm152_vm0, %v1395_v43 }
 0xc52   :  { %2153 = vmatmul.mubr.msk.f32.vlgmr.msra.gmra.mxu0 %vm152_vm0, %v1396_v57 }
 0xc53   :  { %2170 = vmatprep.mubr.msk.f32.mxu0 %vm2350_vm3, %v2347_v20 }
 0xd12   :  { %v2154_v36 = vpop.f32.mrf.mxu0 }
 0xd13   :  { %v1479_v44 = vadd.f32 %v2154_v36, %v1400_v21 }
 0xd14   :  { %v1473_v48 = vpop.f32.mrf.mxu0 }
 0xd15   :  { %v1474_v33 = vadd.f32 %v1473_v48, %v1400_v21  ;;  %v1483_v52 = vadd.f32 %v1479_v44, %v2591_v19  ;;  %v1951_v48 = vld [vmem:[#allocation5 + $0x78] sm:$0xff]  }
 0xd17   :  { %v1487_v58 = vsel %vm152_vm0, %v1483_v52, 0.0  ;;  %v1482_v49 = vadd.f32 %v1474_v33, %v2589_v40  ;;  %v1948_v40 = vld [vmem:[#allocation5 + $0x58] sm:$0xff]   ;;  %v1950_v33 = vld [vmem:[#allocation5 + $0x70] sm:$0xff]  }
 0xd18   :  { %1488 = vadd.xlane.f32.xlu0 %v1487_v58  ;;  %v1926_v23 = vunpack.c.h.bf16 %v1948_v40  ;;  %v1925_v22 = vunpack.c.l.bf16 %v1948_v40  ;;  %v1937_v58 = vunpack.c.l.bf16 %v1951_v48  ;;  %v1933_v16 = vunpack.c.l.bf16 %v1950_v33 }
 0xd19   :  { %v1484_v35 = vsel %vm152_vm0, %v1482_v49, 0.0 }
 0xd1a   :  { %1485 = vadd.xlane.f32.xlu1 %v1484_v35  ;;  %2159 = vmatprep.subr.mxu1 %v1926_v23 }
 0xd1b   :  { %2160 = vmatpush3.msra.mxu1 %v1926_v23 }
 0xd1c   :  { %2161 = vmatprep.subr.mxu1 %v1925_v22 }
 0xd1d   :  { %2162 = vmatpush3.msra.mxu1 %v1925_v22  ;;  %v121_v22 = vmul.f32 0.125, %v1832_v14 }
 0xd1e   :  { %2173 = vmatprep.subr.mxu1 %v2347_v20 }
 0xda1   :  { %v1489_v60 = vpop.xlane.xlu0 %1488 }
 0xda2   :  { %v1491_v59 = vmul.f32 0.03125, %v1489_v60 }
 0xda3   :  { %v1486_v61 = vpop.xlane.xlu1 %1485 }
 0xda4   :  { %v1493_v39 = vsub.f32 %v1483_v52, %v1491_v59  ;;  %v1490_v63 = vmul.f32 0.03125, %v1486_v61  ;;  %v1938_v52 = vunpack.c.h.bf16 %v1951_v48 }
 0xda6   :  { %v1492_v28 = vsub.f32 %v1482_v49, %v1490_v63  ;;  %v1495_v3 = vmul.f32 %v1493_v39, %v1493_v39  ;;  %v1934_v49 = vunpack.c.h.bf16 %v1950_v33 }
 0xda8   :  { %v1499_v4 = vsel %vm152_vm0, %v1495_v3, 0.0  ;;  %v1494_v13 = vmul.f32 %v1492_v28, %v1492_v28 }
 0xda9   :  { %1500 = vadd.xlane.f32.xlu0 %v1499_v4 }
 0xdaa   :  { %v1496_v19 = vsel %vm152_vm0, %v1494_v13, 0.0  ;;  %v1644_v13 = vrot.slane %v2597_v32, %v882_v18  ;;  %v1728_v18 = vld [vmem:[#allocation5 + $0x80] sm:$0x1] }
 0xdab   :  { %1497 = vadd.xlane.f32.xlu1 %v1496_v19 }
 0xe32   :  { %v1501_v0 = vpop.xlane.xlu0 %1500 }
 0xe33   :  { %v1503_v26 = vmul.f32 0.03125, %v1501_v0 }
 0xe34   :  { %v1498_v27 = vpop.xlane.xlu1 %1497 }
 0xe35   :  { %v1505_v1 = vadd.f32 1e-05, %v1503_v26  ;;  %v1502_v30 = vmul.f32 0.03125, %v1498_v27 }
 0xe37   :  { %2267 = vrsqrt.f32 %v1505_v1  ;;  %v1504_v31 = vadd.f32 1e-05, %v1502_v30 }
 0xe39   :  { %2269 = vrsqrt.f32 %v1504_v31 }
 0xe44   :  { %v2268_v8 = vpop.eup %2267 }
 0xe45   :  { %v1509_v41 = vmul.f32 %v2268_v8, %v1493_v39 }
 0xe46   :  { %v2270_v42 = vpop.eup %2269 }
 0xe47   :  { %v1508_v34 = vmul.f32 %v2270_v42, %v1492_v28  ;;  %v1515_v25 = vmul.f32 %v1513_v5, %v1509_v41  ;;  %v1638_v28 = vrot.slane %v2597_v32, %v876_v17  ;;  %v1729_v32 = vunpack.c.l.bf16 %v1728_v18 }
 0xe49   :  { %v1514_v45 = vmul.f32 %v1513_v5, %v1508_v34  ;;  %v1521_v24 = vadd.f32 %v1519_v11, %v1515_v25  ;;  %v1733_v26 = vrot.slane %v1729_v32, %v2388_v12 }
 0xe4b   :  { %v1520_v46 = vadd.f32 %v1519_v11, %v1514_v45 }
 0xe4d   :  { %2163 = vmatprep.mubr.msk.f32.mxu1 %vm152_vm0, %v1520_v46 }
 0xe4e   :  { %2164 = vmatmul.mubr.msk.f32.vlgmr.msra.gmra.mxu1 %vm152_vm0, %v1521_v24 }
 0xe4f   :  { %2181 = vmatprep.mubr.msk.f32.mxu1 %vm2350_vm3, %v2347_v20  ;;  %2174 = vmatpush3.msra.mxu1 %v1938_v52 }
 0xe50   :  { %2175 = vmatprep.subr.mxu1 %v2347_v20 }
 0xe51   :  { %2176 = vmatpush3.msra.mxu1 %v1937_v58 }
 0xe52   :  { %2177 = vmatprep.subr.mxu1 %v2347_v20 }
 0xe53   :  { %2178 = vmatpush3.msra.mxu1 %v1934_v49 }
 0xe54   :  { %2179 = vmatprep.subr.mxu1 %v2347_v20 }
 0xe55   :  { %2180 = vmatpush3.msra.mxu1 %v1933_v16 }
 0xf0e   :  { %v2165_v10 = vpop.f32.mrf.mxu1 }
 0xf0f   :  { %v1604_v50 = vadd.f32 %v2165_v10, %v1525_v47 }
 0xf10   :  { %v1598_v38 = vpop.f32.mrf.mxu1 }
 0xf11   :  { %v1608_v53 = vmax.f32 %v1604_v50, 0.0  ;;  %v1599_v54 = vadd.f32 %v1598_v38, %v1525_v47 }
 0xf13   :  { %v1607_v7 = vmax.f32 %v1599_v54, 0.0  ;;  %v1612_v51 = vsel %vm152_vm0, %v1608_v53, 0.0 }
 0xf14   :  { %1613 = vadd.xlane.f32.xlu1 %v1612_v51 }
 0xf15   :  { %v1609_v15 = vsel %vm152_vm0, %v1607_v7, 0.0 }
 0xf16   :  { %1610 = vadd.xlane.f32.xlu0 %v1609_v15 }
 0xf9d   :  { %v1614_v55 = vpop.xlane.xlu1 %1613 }
 0xf9e   :  { %v1616_v2 = vmul.f32 0.03125, %v1614_v55 }
 0xf9f   :  { %v1611_v37 = vpop.xlane.xlu0 %1610 }
 0xfa0   :  { %v1618_v56 = vsub.f32 %v1608_v53, %v1616_v2  ;;  %v1615_v43 = vmul.f32 0.03125, %v1611_v37 }
 0xfa2   :  { %v1617_v57 = vsub.f32 %v1607_v7, %v1615_v43  ;;  %v1620_v21 = vmul.f32 %v1618_v56, %v1618_v56 }
 0xfa4   :  { %v1624_v29 = vsel %vm152_vm0, %v1620_v21, 0.0  ;;  %v1619_v36 = vmul.f32 %v1617_v57, %v1617_v57 }
 0xfa5   :  { %1625 = vadd.xlane.f32.xlu1 %v1624_v29 }
 0xfa6   :  { %v1621_v44 = vsel %vm152_vm0, %v1619_v36, 0.0 }
 0xfa7   :  { %1622 = vadd.xlane.f32.xlu0 %v1621_v44 }
0x102e   :  { %v1626_v35 = vpop.xlane.xlu1 %1625 }
0x102f   :  { %v1628_v60 = vmul.f32 0.03125, %v1626_v35 }
0x1030   :  { %v1623_v59 = vpop.xlane.xlu0 %1622 }
0x1031   :  { %v1630_v61 = vadd.f32 1e-05, %v1628_v60  ;;  %v1627_v39 = vmul.f32 0.03125, %v1623_v59 }
0x1033   :  { %2271 = vrsqrt.f32 %v1630_v61  ;;  %v1629_v63 = vadd.f32 1e-05, %v1627_v39 }
0x1035   :  { %2273 = vrsqrt.f32 %v1629_v63 }
0x1040   :  { %v2272_v3 = vpop.eup %2271 }
0x1041   :  { %v1634_v4 = vmul.f32 %v2272_v3, %v1618_v56 }
0x1042   :  { %v2274_v19 = vpop.eup %2273 }
0x1043   :  { %v1640_v62 = vmul.f32 %v1638_v28, %v1634_v4  ;;  %v1633_v40 = vmul.f32 %v2274_v19, %v1617_v57 }
0x1045   :  { %v1646_v6 = vadd.f32 %v1644_v13, %v1640_v62  ;;  %v1639_v23 = vmul.f32 %v1638_v28, %v1633_v40 }
0x1047   :  { %2167 = vmatpush3.msra.mxu0 %v1646_v6  ;;  %v1645_v0 = vadd.f32 %v1644_v13, %v1639_v23 }
0x1048   :  { %2168 = vmatprep.subr.mxu0 %v2347_v20 }
0x1049   :  { %2169 = vmatpush3.msra.mxu0 %v1645_v0 }
0x104a   :  { %2171 = vmatmul.mubr.msk.f32.vlgmr.msra.gmra.mxu0 %vm397_vm11, %v121_v22 }
0x110a   :  { %v1716_v9 = vpop.f32.mrf.mxu0 }
0x110b   :  { %2182 = vmatmul.mubr.msk.f32.vlgmr.msra.gmra.mxu1 %vm152_vm0, %v1716_v9 }
0x110c   :  { %v2172_v17 = vpop.f32.mrf.mxu0 }
0x11cb   :  { %v1803_v27 = vpop.f32.mrf.mxu1 }
0x11cc   :  { %v1804_v1 = vadd.f32 %v1803_v27, %v1733_v26 }
0x11cd   :  { %v2183_v30 = vpop.f32.mrf.mxu1 }
0x11ce   :  { %1807 = vst [vmem:[#allocation7] sm:$0xff] %v1804_v1 }
0x11cf   :  { %2326 = shalt.err (!%p2323_p0)
}
0x11d0   :  { %1817 = dma.vmem_to_hbm [thread:$0]  %s1815_s23, 128, %s2732_s2, [#allocation4]  }
0x11d1   :  { %2339 = dma.done.wait [#allocation4], 128  }
0x11d2   :  { %2340 = vsyncadd [#allocation4], 4294967168 }
0x11d3   :  { %1821 = vsyncpa [#allocation3], 1 }
0x11d4   :  { %1822 = vsyncpa [#allocation6], 1 }
0x11d5   :  { %1823 = vsyncpa [#allocation4], 1 }

</bundles_post_ra>
